<compile_context>
chip_gen: v7x
topology: tpu7x:2x2x1
jax: 0.10.0
libtpu: 0.0.40
codegen_flags: <defaults>
</compile_context>

<pallas_src>
import math
import functools

import jax
import jax.numpy as jnp
from jax.experimental import pallas as pl
from jax.experimental.pallas import tpu as pltpu


# ----------------------------- kernel helpers -----------------------------

def _layernorm(x, w, b, eps):
    # PyTorch LayerNorm: biased variance over last dim, f32 math.
    mu = jnp.mean(x, axis=-1, keepdims=True)
    var = jnp.mean((x - mu) ** 2, axis=-1, keepdims=True)
    return (x - mu) * jax.lax.rsqrt(var + eps) * w + b


# ------------------------------ fused kernel -------------------------------

def fused_vit_kernel(nhead, batch, eps,
                     # constant inputs
                     patches_ref, fc1w_ref, fc1b_ref, clspe_ref, perest_ref,
                     bidc_ref, bidr_ref,
                     # per-layer (stacked along leading L axis, lane-dense)
                     wqkv_ref, bqkv_ref, wo_ref, bo_ref,
                     ln1w_ref, ln1b_ref,
                     wff1_ref, bff1_ref, wff2_ref, bff2_ref,
                     ln2w_ref, ln2b_ref,
                     # head
                     encw_ref, encb_ref, fc2w_ref, fc2b_ref,
                     # output + scratch
                     o_ref, x_ref):
    layer = pl.program_id(0)
    n_tok, d_emb = x_ref.shape           # n_tok = B * T (seq-first: row = t*B + b)
    dh = d_emb // nhead
    scale = 1.0 / math.sqrt(dh)
    bf16 = jnp.bfloat16

    # ---- step 0: fc1 patch embedding + class token + positional encoding ----
    @pl.when(layer == 0)
    def _init():
        h = jnp.dot(patches_ref[...], fc1w_ref[...],
                    preferred_element_type=jnp.float32)
        h = jnp.maximum(h + fc1b_ref[...], 0.0)                   # relu(fc1)
        x_ref[0:batch, :] = clspe_ref[...]                        # class tok + pe[0]
        x_ref[batch:, :] = h + perest_ref[...]                    # patches + pe[1:]

    x = x_ref[...]                                                # [N, E] f32 (VMEM-resident)

    # ---- multi-head self-attention ----
    # Merged QKV: single lane-dense matmul, result stays [N, 3E] (no padded
    # per-head f32 storage).
    xb = x.astype(bf16)
    qkv = jnp.dot(xb, wqkv_ref[0],
                  preferred_element_type=jnp.float32) + bqkv_ref[0]   # [N, 3E]

    # Additive cross-batch mask built in-kernel from tiny batch-id vectors
    # (forbid attention across different batch elements).
    neg = jnp.where(bidc_ref[...] == bidr_ref[...], 0.0, -1e30)       # [N, N] f32

    # Per-head score/softmax/context with plain 2-D matmuls (K = dh is
    # inherent to the algorithm); context heads are concatenated lane-wise so
    # the output projection is a single [N,E] x [E,E] matmul.
    ctx_parts = []
    for h in range(nhead):
        qh = qkv[:, h * dh:(h + 1) * dh].astype(bf16)                     # [N, dh]
        kh = qkv[:, d_emb + h * dh:d_emb + (h + 1) * dh].astype(bf16)     # [N, dh]
        vh = qkv[:, 2 * d_emb + h * dh:2 * d_emb + (h + 1) * dh].astype(bf16)
        sh = jax.lax.dot_general(qh, kh, (((1,), (1,)), ((), ())),
                                 preferred_element_type=jnp.float32)      # q @ k.T
        sh = sh * scale + neg
        sh = sh - jnp.max(sh, axis=-1, keepdims=True)
        ph = jnp.exp(sh)
        ph = ph / jnp.sum(ph, axis=-1, keepdims=True)                     # exact softmax
        ctx_parts.append(jnp.dot(ph.astype(bf16), vh,
                                 preferred_element_type=jnp.float32))     # [N, dh]
    ctx = jnp.concatenate(ctx_parts, axis=-1).astype(bf16)                # [N, E]

    attn = jnp.dot(ctx, wo_ref[0],
                   preferred_element_type=jnp.float32) + bo_ref[0]        # [N, E]

    # residual + norm1 (post-norm, like PyTorch TransformerEncoderLayer)
    x = _layernorm(x + attn, ln1w_ref[0], ln1b_ref[0], eps)

    # feed-forward: linear1 -> relu -> linear2
    h1 = jnp.dot(x.astype(bf16), wff1_ref[0],
                 preferred_element_type=jnp.float32) + bff1_ref[0]
    h1 = jnp.maximum(h1, 0.0)
    h2 = jnp.dot(h1.astype(bf16), wff2_ref[0],
                 preferred_element_type=jnp.float32) + bff2_ref[0]

    # residual + norm2
    x = _layernorm(x + h2, ln2w_ref[0], ln2b_ref[0], eps)
    x_ref[...] = x

    # ---- last step: final encoder LayerNorm (class tokens) + fc2 head ----
    @pl.when(layer == pl.num_programs(0) - 1)
    def _head():
        cls = _layernorm(x[0:batch, :], encw_ref[...], encb_ref[...], eps)
        y = jnp.dot(cls.astype(bf16), fc2w_ref[...],
                    preferred_element_type=jnp.float32) + fc2b_ref[...]
        o_ref[...] = jnp.maximum(y, 0.0)        # fc2 = Linear -> Dropout -> ReLU


# ------------------------------- glue / model ------------------------------

def positional_encoding_1d(d_model, length):
    assert d_model % 2 == 0
    pos = jnp.arange(length, dtype=jnp.float32)[:, None]
    div = jnp.exp(jnp.arange(0, d_model, 2, dtype=jnp.float32)
                  * (-math.log(10000.0) / d_model))
    pe = jnp.zeros((length, d_model), jnp.float32)
    pe = pe.at[:, 0::2].set(jnp.sin(pos * div))
    pe = pe.at[:, 1::2].set(jnp.cos(pos * div))
    return pe


def init_params(key, *, flattened, d_emb, d_model, dff, num_layer):
    """Deterministic synthetic parameter init (shapes match the PyTorch module)."""
    def linear(k, fan_in, fan_out):
        k1, k2 = jax.random.split(k)
        lim = 1.0 / math.sqrt(fan_in)
        w = jax.random.uniform(k1, (fan_in, fan_out), jnp.float32, -lim, lim)
        b = jax.random.uniform(k2, (1, fan_out), jnp.float32, -lim, lim)
        return w, b

    keys = jax.random.split(key, 4 + num_layer)
    p = {}
    p['fc1_w'], p['fc1_b'] = linear(keys[0], flattened, d_emb)
    p['class_emb'] = jax.random.uniform(keys[1], (d_emb,), jnp.float32)  # torch.rand
    p['fc2_w'], p['fc2_b'] = linear(keys[2], d_emb, d_model)
    p['enc_norm_w'] = jnp.ones((1, d_emb), jnp.float32)
    p['enc_norm_b'] = jnp.zeros((1, d_emb), jnp.float32)

    layers = []
    for li in range(num_layer):
        lk = jax.random.split(keys[4 + li], 6)
        L = {}
        L['wq'], L['bq'] = linear(lk[0], d_emb, d_emb)
        L['wk'], L['bk'] = linear(lk[1], d_emb, d_emb)
        L['wv'], L['bv'] = linear(lk[2], d_emb, d_emb)
        L['wo'], L['bo'] = linear(lk[3], d_emb, d_emb)
        L['wff1'], L['bff1'] = linear(lk[4], d_emb, dff)
        L['wff2'], L['bff2'] = linear(lk[5], dff, d_emb)
        L['ln1w'] = jnp.ones((1, d_emb), jnp.float32)
        L['ln1b'] = jnp.zeros((1, d_emb), jnp.float32)
        L['ln2w'] = jnp.ones((1, d_emb), jnp.float32)
        L['ln2b'] = jnp.zeros((1, d_emb), jnp.float32)
        layers.append(L)
    p['layers'] = layers
    return p


def prepare_packed_params(params):
    """Stack per-layer weights along L, lane-dense layouts, bf16 matmul operands."""
    layers = params['layers']
    bf16 = jnp.bfloat16
    stack = lambda fn: jnp.stack([fn(l) for l in layers])

    wqkv = stack(lambda l: jnp.concatenate([l['wq'], l['wk'], l['wv']], axis=1))  # [L, E, 3E]
    bqkv = stack(lambda l: jnp.concatenate([l['bq'], l['bk'], l['bv']], axis=1))  # [L, 1, 3E]

    return {
        'fc1_w': params['fc1_w'].astype(bf16), 'fc1_b': params['fc1_b'],
        'fc2_w': params['fc2_w'].astype(bf16), 'fc2_b': params['fc2_b'],
        'enc_norm_w': params['enc_norm_w'], 'enc_norm_b': params['enc_norm_b'],
        'wqkv': wqkv.astype(bf16), 'bqkv': bqkv,
        'wo': stack(lambda l: l['wo']).astype(bf16),        # [L, E, E] (un-split)
        'bo': stack(lambda l: l['bo']),
        'ln1w': stack(lambda l: l['ln1w']), 'ln1b': stack(lambda l: l['ln1b']),
        'ln2w': stack(lambda l: l['ln2w']), 'ln2b': stack(lambda l: l['ln2b']),
        'wff1': stack(lambda l: l['wff1']).astype(bf16), 'bff1': stack(lambda l: l['bff1']),
        'wff2': stack(lambda l: l['wff2']).astype(bf16), 'bff2': stack(lambda l: l['bff2']),
    }


def vit_forward(x, params, *, split, d_emb, d_model, nhead, num_layer, eps=1e-5):
    B, C, H, W = x.shape
    sh, sw = split
    ph, pw = H // sh, W // sw
    S = sh * sw
    F = ph * pw * C
    T = S + 1
    N = B * T
    L = num_layer
    dff = params['layers'][0]['wff1'].shape[1]
    orig_dtype = x.dtype

    # rearrange 'b c (sh h) (sw w) -> (sh sw) b (h w c)', flattened seq-first
    xf = x.astype(jnp.float32)
    xr = xf.reshape(B, C, sh, ph, sw, pw)
    xr = jnp.transpose(xr, (2, 4, 0, 3, 5, 1)).reshape(S * B, F)   # row = s*B + b
    xr = xr.astype(jnp.bfloat16)                                   # matmul-only operand

    # positional encoding / class token (constant glue)
    pe = positional_encoding_1d(d_emb, T)                           # [T, E]
    cls_pe = jnp.broadcast_to(params['class_emb'][None, :] + pe[0:1, :], (B, d_emb))
    pe_rest = jnp.repeat(pe[1:], B, axis=0)                         # [S*B, E]

    # tiny batch-id vectors; the [N, N] mask is built in-kernel from these
    bidx = (jnp.arange(N, dtype=jnp.int32) % B).astype(jnp.float32)  # row = t*B + b
    bid_col = bidx.reshape(N, 1)
    bid_row = bidx.reshape(1, N)

    pk = prepare_packed_params(params)

    def const_spec(shape):
        return pl.BlockSpec(shape, lambda l: (0,) * len(shape))

    def layer_spec(shape):   # per-layer weight stacked along leading L axis
        return pl.BlockSpec((1,) + shape, lambda l: (l,) + (0,) * len(shape))

    grid_spec = pltpu.PrefetchScalarGridSpec(
        num_scalar_prefetch=0,
        grid=(L,),
        in_specs=[
            const_spec((S * B, F)),                             # patches (bf16)
            const_spec((F, d_emb)), const_spec((1, d_emb)),     # fc1 w/b
            const_spec((B, d_emb)),                             # class token + pe[0]
            const_spec((S * B, d_emb)),                         # pe[1:]
            const_spec((N, 1)), const_spec((1, N)),             # batch ids (mask)
            layer_spec((d_emb, 3 * d_emb)),                     # wqkv  [E, 3E]
            layer_spec((1, 3 * d_emb)),                         # bqkv
            layer_spec((d_emb, d_emb)),                         # wo    [E, E]
            layer_spec((1, d_emb)),                             # bo
            layer_spec((1, d_emb)), layer_spec((1, d_emb)),     # ln1 w/b
            layer_spec((d_emb, dff)), layer_spec((1, dff)),     # ff1
            layer_spec((dff, d_emb)), layer_spec((1, d_emb)),   # ff2
            layer_spec((1, d_emb)), layer_spec((1, d_emb)),     # ln2 w/b
            const_spec((1, d_emb)), const_spec((1, d_emb)),     # encoder final LN
            const_spec((d_emb, d_model)), const_spec((1, d_model)),  # fc2
        ],
        out_specs=pl.BlockSpec((B, d_model), lambda l: (0, 0)),
        scratch_shapes=[pltpu.VMEM((N, d_emb), jnp.float32)],   # resident tokens
    )

    out = pl.pallas_call(
        functools.partial(fused_vit_kernel, nhead, B, eps),
        out_shape=jax.ShapeDtypeStruct((B, d_model), jnp.float32),
        grid_spec=grid_spec,
        compiler_params=pltpu.CompilerParams(
            dimension_semantics=("arbitrary",)),
    )(xr, pk['fc1_w'], pk['fc1_b'], cls_pe, pe_rest, bid_col, bid_row,
      pk['wqkv'], pk['bqkv'], pk['wo'], pk['bo'],
      pk['ln1w'], pk['ln1b'],
      pk['wff1'], pk['bff1'], pk['wff2'], pk['bff2'],
      pk['ln2w'], pk['ln2b'],
      pk['enc_norm_w'], pk['enc_norm_b'], pk['fc2_w'], pk['fc2_b'])

    return out.astype(orig_dtype)


# ---------------------------------- main -----------------------------------

if __name__ == "__main__":
    # Small shapes consistent with the module:
    #   img_size = (C=4, H=16, W=16), split_grid = (4, 4)
    #   -> S = 16 patches, T = 17 tokens, flattened = 4*4*4 = 64
    B = 2
    C, H, W = 4, 16, 16
    split = (4, 4)
    d_emb = 32
    d_model = 32
    nhead = 4
    num_layer = 2
    dff = 64

    key = jax.random.PRNGKey(0)
    kx, kp = jax.random.split(key)
    x = jax.random.normal(kx, (B, C, H, W), jnp.float32)

    flattened = (H // split[0]) * (W // split[1]) * C
    params = init_params(kp, flattened=flattened, d_emb=d_emb,
                         d_model=d_model, dff=dff, num_layer=num_layer)

    fwd = jax.jit(functools.partial(vit_forward, split=split, d_emb=d_emb,
                                    d_model=d_model, nhead=nhead,
                                    num_layer=num_layer, eps=1e-5))
    out = jax.block_until_ready(fwd(x, params))

    assert out.shape == (B, d_model), out.shape
    assert bool(jnp.all(jnp.isfinite(out)))
    print("KERNEL_OK")
</pallas_src>

<mosaic_0001>
module attributes {stable_mosaic.version = 11 : i64} {
  func.func @fused_vit_kernel(%arg0: i32, %arg1: memref<32x64xbf16, #tpu.memory_space<vmem>>, %arg2: memref<64x32xbf16, #tpu.memory_space<vmem>>, %arg3: memref<1x32xf32, #tpu.memory_space<vmem>>, %arg4: memref<2x32xf32, #tpu.memory_space<vmem>>, %arg5: memref<32x32xf32, #tpu.memory_space<vmem>>, %arg6: memref<34x1xf32, #tpu.memory_space<vmem>>, %arg7: memref<1x34xf32, #tpu.memory_space<vmem>>, %arg8: memref<1x32x96xbf16, #tpu.memory_space<vmem>>, %arg9: memref<1x1x96xf32, #tpu.memory_space<vmem>>, %arg10: memref<1x32x32xbf16, #tpu.memory_space<vmem>>, %arg11: memref<1x1x32xf32, #tpu.memory_space<vmem>>, %arg12: memref<1x1x32xf32, #tpu.memory_space<vmem>>, %arg13: memref<1x1x32xf32, #tpu.memory_space<vmem>>, %arg14: memref<1x32x64xbf16, #tpu.memory_space<vmem>>, %arg15: memref<1x1x64xf32, #tpu.memory_space<vmem>>, %arg16: memref<1x64x32xbf16, #tpu.memory_space<vmem>>, %arg17: memref<1x1x32xf32, #tpu.memory_space<vmem>>, %arg18: memref<1x1x32xf32, #tpu.memory_space<vmem>>, %arg19: memref<1x1x32xf32, #tpu.memory_space<vmem>>, %arg20: memref<1x32xf32, #tpu.memory_space<vmem>>, %arg21: memref<1x32xf32, #tpu.memory_space<vmem>>, %arg22: memref<32x32xbf16, #tpu.memory_space<vmem>>, %arg23: memref<1x32xf32, #tpu.memory_space<vmem>>, %arg24: memref<2x32xf32, #tpu.memory_space<vmem>>, %arg25: memref<34x32xf32, #tpu.memory_space<vmem>>) attributes {dimension_semantics = [#tpu.dimension_semantics<arbitrary>], iteration_bounds = array<i64: 2>, scalar_prefetch = 0 : i64, scratch_operands = 1 : i64, tpu.core_type = #tpu.core_type<tc>, window_params = [{pipeline_mode = #tpu.pipeline_mode<synchronous>, transform_indices = @transform_0, window_bounds = array<i64: 32, 64>}, {pipeline_mode = #tpu.pipeline_mode<synchronous>, transform_indices = @transform_1, window_bounds = array<i64: 64, 32>}, {pipeline_mode = #tpu.pipeline_mode<synchronous>, transform_indices = @transform_2, window_bounds = array<i64: 1, 32>}, {pipeline_mode = #tpu.pipeline_mode<synchronous>, transform_indices = @transform_3, window_bounds = array<i64: 2, 32>}, {pipeline_mode = #tpu.pipeline_mode<synchronous>, transform_indices = @transform_4, window_bounds = array<i64: 32, 32>}, {pipeline_mode = #tpu.pipeline_mode<synchronous>, transform_indices = @transform_5, window_bounds = array<i64: 34, 1>}, {pipeline_mode = #tpu.pipeline_mode<synchronous>, transform_indices = @transform_6, window_bounds = array<i64: 1, 34>}, {transform_indices = @transform_7, window_bounds = array<i64: 1, 32, 96>}, {transform_indices = @transform_8, window_bounds = array<i64: 1, 1, 96>}, {transform_indices = @transform_9, window_bounds = array<i64: 1, 32, 32>}, {transform_indices = @transform_10, window_bounds = array<i64: 1, 1, 32>}, {transform_indices = @transform_11, window_bounds = array<i64: 1, 1, 32>}, {transform_indices = @transform_12, window_bounds = array<i64: 1, 1, 32>}, {transform_indices = @transform_13, window_bounds = array<i64: 1, 32, 64>}, {transform_indices = @transform_14, window_bounds = array<i64: 1, 1, 64>}, {transform_indices = @transform_15, window_bounds = array<i64: 1, 64, 32>}, {transform_indices = @transform_16, window_bounds = array<i64: 1, 1, 32>}, {transform_indices = @transform_17, window_bounds = array<i64: 1, 1, 32>}, {transform_indices = @transform_18, window_bounds = array<i64: 1, 1, 32>}, {pipeline_mode = #tpu.pipeline_mode<synchronous>, transform_indices = @transform_19, window_bounds = array<i64: 1, 32>}, {pipeline_mode = #tpu.pipeline_mode<synchronous>, transform_indices = @transform_20, window_bounds = array<i64: 1, 32>}, {pipeline_mode = #tpu.pipeline_mode<synchronous>, transform_indices = @transform_21, window_bounds = array<i64: 32, 32>}, {pipeline_mode = #tpu.pipeline_mode<synchronous>, transform_indices = @transform_22, window_bounds = array<i64: 1, 32>}, {pipeline_mode = #tpu.pipeline_mode<synchronous>, transform_indices = @transform_23, window_bounds = array<i64: 2, 32>}]} {
    %c0_i32 = arith.constant 0 : i32
    %0 = arith.cmpi eq, %arg0, %c0_i32 : i32
    %1 = arith.extui %0 : i1 to i32
    %c0_i32_0 = arith.constant 0 : i32
    %2 = arith.cmpi ne, %1, %c0_i32_0 : i32
    scf.if %2 {
      %c0_81 = arith.constant 0 : index
      %c0_82 = arith.constant 0 : index
      %189 = vector.load %arg1[%c0_81, %c0_82] : memref<32x64xbf16, #tpu.memory_space<vmem>>, vector<32x64xbf16>
      %c0_83 = arith.constant 0 : index
      %c0_84 = arith.constant 0 : index
      %190 = vector.load %arg2[%c0_83, %c0_84] : memref<64x32xbf16, #tpu.memory_space<vmem>>, vector<64x32xbf16>
      %cst_85 = arith.constant dense<0.000000e+00> : vector<32x32xf32>
      %191 = tpu.matmul %189, %190, %cst_85 {dimension_numbers = #tpu.dot_dimension_numbers<[1], [0], [0], [1], [0, 0, 1, 1], [], []>} : vector<32x64xbf16>, vector<64x32xbf16>, vector<32x32xf32> -> vector<32x32xf32>
      %c0_86 = arith.constant 0 : index
      %c0_87 = arith.constant 0 : index
      %192 = vector.load %arg3[%c0_86, %c0_87] : memref<1x32xf32, #tpu.memory_space<vmem>>, vector<1x32xf32>
      %193 = vector.broadcast %192 : vector<1x32xf32> to vector<32x32xf32>
      %194 = arith.addf %191, %193 : vector<32x32xf32>
      %cst_88 = arith.constant 0.000000e+00 : f32
      %195 = vector.broadcast %cst_88 : f32 to vector<32x32xf32>
      %196 = arith.maximumf %194, %195 : vector<32x32xf32>
      %c0_89 = arith.constant 0 : index
      %c0_90 = arith.constant 0 : index
      %197 = vector.load %arg4[%c0_89, %c0_90] : memref<2x32xf32, #tpu.memory_space<vmem>>, vector<2x32xf32>
      %c0_91 = arith.constant 0 : index
      %c0_92 = arith.constant 0 : index
      %198 = vector.load %arg25[%c0_91, %c0_92] : memref<34x32xf32, #tpu.memory_space<vmem>>, vector<2x32xf32>
      tpu.vector_store %arg25[%c0_91, %c0_92], %197 {strides = array<i32>} : memref<34x32xf32, #tpu.memory_space<vmem>>, vector<2x32xf32>,
      %c0_93 = arith.constant 0 : index
      %c0_94 = arith.constant 0 : index
      %199 = vector.load %arg5[%c0_93, %c0_94] : memref<32x32xf32, #tpu.memory_space<vmem>>, vector<32x32xf32>
      %200 = arith.addf %196, %199 : vector<32x32xf32>
      %c2 = arith.constant 2 : index
      %c0_95 = arith.constant 0 : index
      %201 = vector.load %arg25[%c2, %c0_95] : memref<34x32xf32, #tpu.memory_space<vmem>>, vector<32x32xf32>
      tpu.vector_store %arg25[%c2, %c0_95], %200 {strides = array<i32>} : memref<34x32xf32, #tpu.memory_space<vmem>>, vector<32x32xf32>,
    } else {
    }
    %c0 = arith.constant 0 : index
    %c0_1 = arith.constant 0 : index
    %3 = vector.load %arg25[%c0, %c0_1] : memref<34x32xf32, #tpu.memory_space<vmem>>, vector<34x32xf32>
    %4 = arith.truncf %3 : vector<34x32xf32> to vector<34x32xbf16>
    %c0_2 = arith.constant 0 : index
    %c0_3 = arith.constant 0 : index
    %c0_4 = arith.constant 0 : index
    %5 = vector.load %arg8[%c0_2, %c0_3, %c0_4] : memref<1x32x96xbf16, #tpu.memory_space<vmem>>, vector<1x32x96xbf16>
    %6 = vector.shape_cast %5 : vector<1x32x96xbf16> to vector<32x96xbf16>
    %cst = arith.constant dense<0.000000e+00> : vector<34x96xf32>
    %7 = tpu.matmul %4, %6, %cst {dimension_numbers = #tpu.dot_dimension_numbers<[1], [0], [0], [1], [0, 0, 1, 1], [], []>} : vector<34x32xbf16>, vector<32x96xbf16>, vector<34x96xf32> -> vector<34x96xf32>
    %c0_5 = arith.constant 0 : index
    %c0_6 = arith.constant 0 : index
    %c0_7 = arith.constant 0 : index
    %8 = vector.load %arg9[%c0_5, %c0_6, %c0_7] : memref<1x1x96xf32, #tpu.memory_space<vmem>>, vector<1x1x96xf32>
    %9 = vector.shape_cast %8 : vector<1x1x96xf32> to vector<1x96xf32>
    %10 = vector.broadcast %9 : vector<1x96xf32> to vector<34x96xf32>
    %11 = arith.addf %7, %10 : vector<34x96xf32>
    %c0_8 = arith.constant 0 : index
    %c0_9 = arith.constant 0 : index
    %12 = vector.load %arg6[%c0_8, %c0_9] : memref<34x1xf32, #tpu.memory_space<vmem>>, vector<34x1xf32>
    %c0_10 = arith.constant 0 : index
    %c0_11 = arith.constant 0 : index
    %13 = vector.load %arg7[%c0_10, %c0_11] : memref<1x34xf32, #tpu.memory_space<vmem>>, vector<1x34xf32>
    %14 = vector.broadcast %12 : vector<34x1xf32> to vector<34x34xf32>
    %15 = vector.broadcast %13 : vector<1x34xf32> to vector<34x34xf32>
    %16 = arith.cmpf oeq, %14, %15 : vector<34x34xf32>
    %cst_12 = arith.constant 0.000000e+00 : f32
    %cst_13 = arith.constant -1.000000e+30 : f32
    %17 = vector.broadcast %cst_12 : f32 to vector<34x34xf32>
    %18 = vector.broadcast %cst_13 : f32 to vector<34x34xf32>
    %19 = arith.select %16, %17, %18 : vector<34x34xi1>, vector<34x34xf32>
    %20 = vector.extract_strided_slice %11 {offsets = [0, 0], sizes = [34, 8], strides = [1, 1]} : vector<34x96xf32> to vector<34x8xf32>
    %21 = arith.truncf %20 : vector<34x8xf32> to vector<34x8xbf16>
    %22 = vector.extract_strided_slice %11 {offsets = [0, 32], sizes = [34, 8], strides = [1, 1]} : vector<34x96xf32> to vector<34x8xf32>
    %23 = arith.truncf %22 : vector<34x8xf32> to vector<34x8xbf16>
    %24 = vector.extract_strided_slice %11 {offsets = [0, 64], sizes = [34, 8], strides = [1, 1]} : vector<34x96xf32> to vector<34x8xf32>
    %25 = arith.truncf %24 : vector<34x8xf32> to vector<34x8xbf16>
    %cst_14 = arith.constant dense<0.000000e+00> : vector<34x34xf32>
    %26 = tpu.matmul %21, %23, %cst_14 {dimension_numbers = #tpu.dot_dimension_numbers<[1], [1], [0], [0], [0, 0, 1, 0], [], []>} : vector<34x8xbf16>, vector<34x8xbf16>, vector<34x34xf32> -> vector<34x34xf32>
    %cst_15 = arith.constant 0.353553385 : f32
    %27 = vector.broadcast %cst_15 : f32 to vector<34x34xf32>
    %28 = arith.mulf %26, %27 : vector<34x34xf32>
    %29 = arith.addf %28, %19 : vector<34x34xf32>
    %cst_16 = arith.constant dense<0xFF800000> : vector<34xf32>
    %30 = vector.multi_reduction <maximumf>, %29, %cst_16 [1] : vector<34x34xf32> to vector<34xf32>
    %31 = vector.shape_cast %30 : vector<34xf32> to vector<34x1xf32>
    %32 = vector.broadcast %31 : vector<34x1xf32> to vector<34x34xf32>
    %33 = arith.subf %29, %32 : vector<34x34xf32>
    %34 = math.exp %33 : vector<34x34xf32>
    %cst_17 = arith.constant dense<0.000000e+00> : vector<34xf32>
    %35 = vector.multi_reduction <add>, %34, %cst_17 [1] : vector<34x34xf32> to vector<34xf32>
    %36 = vector.shape_cast %35 : vector<34xf32> to vector<34x1xf32>
    %37 = vector.broadcast %36 : vector<34x1xf32> to vector<34x34xf32>
    %38 = arith.divf %34, %37 : vector<34x34xf32>
    %39 = arith.truncf %38 : vector<34x34xf32> to vector<34x34xbf16>
    %cst_18 = arith.constant dense<0.000000e+00> : vector<34x8xf32>
    %40 = tpu.matmul %39, %25, %cst_18 {dimension_numbers = #tpu.dot_dimension_numbers<[1], [0], [0], [1], [0, 0, 1, 1], [], []>} : vector<34x34xbf16>, vector<34x8xbf16>, vector<34x8xf32> -> vector<34x8xf32>
    %41 = vector.extract_strided_slice %11 {offsets = [0, 8], sizes = [34, 8], strides = [1, 1]} : vector<34x96xf32> to vector<34x8xf32>
    %42 = arith.truncf %41 : vector<34x8xf32> to vector<34x8xbf16>
    %43 = vector.extract_strided_slice %11 {offsets = [0, 40], sizes = [34, 8], strides = [1, 1]} : vector<34x96xf32> to vector<34x8xf32>
    %44 = arith.truncf %43 : vector<34x8xf32> to vector<34x8xbf16>
    %45 = vector.extract_strided_slice %11 {offsets = [0, 72], sizes = [34, 8], strides = [1, 1]} : vector<34x96xf32> to vector<34x8xf32>
    %46 = arith.truncf %45 : vector<34x8xf32> to vector<34x8xbf16>
    %cst_19 = arith.constant dense<0.000000e+00> : vector<34x34xf32>
    %47 = tpu.matmul %42, %44, %cst_19 {dimension_numbers = #tpu.dot_dimension_numbers<[1], [1], [0], [0], [0, 0, 1, 0], [], []>} : vector<34x8xbf16>, vector<34x8xbf16>, vector<34x34xf32> -> vector<34x34xf32>
    %cst_20 = arith.constant 0.353553385 : f32
    %48 = vector.broadcast %cst_20 : f32 to vector<34x34xf32>
    %49 = arith.mulf %47, %48 : vector<34x34xf32>
    %50 = arith.addf %49, %19 : vector<34x34xf32>
    %cst_21 = arith.constant dense<0xFF800000> : vector<34xf32>
    %51 = vector.multi_reduction <maximumf>, %50, %cst_21 [1] : vector<34x34xf32> to vector<34xf32>
    %52 = vector.shape_cast %51 : vector<34xf32> to vector<34x1xf32>
    %53 = vector.broadcast %52 : vector<34x1xf32> to vector<34x34xf32>
    %54 = arith.subf %50, %53 : vector<34x34xf32>
    %55 = math.exp %54 : vector<34x34xf32>
    %cst_22 = arith.constant dense<0.000000e+00> : vector<34xf32>
    %56 = vector.multi_reduction <add>, %55, %cst_22 [1] : vector<34x34xf32> to vector<34xf32>
    %57 = vector.shape_cast %56 : vector<34xf32> to vector<34x1xf32>
    %58 = vector.broadcast %57 : vector<34x1xf32> to vector<34x34xf32>
    %59 = arith.divf %55, %58 : vector<34x34xf32>
    %60 = arith.truncf %59 : vector<34x34xf32> to vector<34x34xbf16>
    %cst_23 = arith.constant dense<0.000000e+00> : vector<34x8xf32>
    %61 = tpu.matmul %60, %46, %cst_23 {dimension_numbers = #tpu.dot_dimension_numbers<[1], [0], [0], [1], [0, 0, 1, 1], [], []>} : vector<34x34xbf16>, vector<34x8xbf16>, vector<34x8xf32> -> vector<34x8xf32>
    %62 = vector.extract_strided_slice %11 {offsets = [0, 16], sizes = [34, 8], strides = [1, 1]} : vector<34x96xf32> to vector<34x8xf32>
    %63 = arith.truncf %62 : vector<34x8xf32> to vector<34x8xbf16>
    %64 = vector.extract_strided_slice %11 {offsets = [0, 48], sizes = [34, 8], strides = [1, 1]} : vector<34x96xf32> to vector<34x8xf32>
    %65 = arith.truncf %64 : vector<34x8xf32> to vector<34x8xbf16>
    %66 = vector.extract_strided_slice %11 {offsets = [0, 80], sizes = [34, 8], strides = [1, 1]} : vector<34x96xf32> to vector<34x8xf32>
    %67 = arith.truncf %66 : vector<34x8xf32> to vector<34x8xbf16>
    %cst_24 = arith.constant dense<0.000000e+00> : vector<34x34xf32>
    %68 = tpu.matmul %63, %65, %cst_24 {dimension_numbers = #tpu.dot_dimension_numbers<[1], [1], [0], [0], [0, 0, 1, 0], [], []>} : vector<34x8xbf16>, vector<34x8xbf16>, vector<34x34xf32> -> vector<34x34xf32>
    %cst_25 = arith.constant 0.353553385 : f32
    %69 = vector.broadcast %cst_25 : f32 to vector<34x34xf32>
    %70 = arith.mulf %68, %69 : vector<34x34xf32>
    %71 = arith.addf %70, %19 : vector<34x34xf32>
    %cst_26 = arith.constant dense<0xFF800000> : vector<34xf32>
    %72 = vector.multi_reduction <maximumf>, %71, %cst_26 [1] : vector<34x34xf32> to vector<34xf32>
    %73 = vector.shape_cast %72 : vector<34xf32> to vector<34x1xf32>
    %74 = vector.broadcast %73 : vector<34x1xf32> to vector<34x34xf32>
    %75 = arith.subf %71, %74 : vector<34x34xf32>
    %76 = math.exp %75 : vector<34x34xf32>
    %cst_27 = arith.constant dense<0.000000e+00> : vector<34xf32>
    %77 = vector.multi_reduction <add>, %76, %cst_27 [1] : vector<34x34xf32> to vector<34xf32>
    %78 = vector.shape_cast %77 : vector<34xf32> to vector<34x1xf32>
    %79 = vector.broadcast %78 : vector<34x1xf32> to vector<34x34xf32>
    %80 = arith.divf %76, %79 : vector<34x34xf32>
    %81 = arith.truncf %80 : vector<34x34xf32> to vector<34x34xbf16>
    %cst_28 = arith.constant dense<0.000000e+00> : vector<34x8xf32>
    %82 = tpu.matmul %81, %67, %cst_28 {dimension_numbers = #tpu.dot_dimension_numbers<[1], [0], [0], [1], [0, 0, 1, 1], [], []>} : vector<34x34xbf16>, vector<34x8xbf16>, vector<34x8xf32> -> vector<34x8xf32>
    %83 = vector.extract_strided_slice %11 {offsets = [0, 24], sizes = [34, 8], strides = [1, 1]} : vector<34x96xf32> to vector<34x8xf32>
    %84 = arith.truncf %83 : vector<34x8xf32> to vector<34x8xbf16>
    %85 = vector.extract_strided_slice %11 {offsets = [0, 56], sizes = [34, 8], strides = [1, 1]} : vector<34x96xf32> to vector<34x8xf32>
    %86 = arith.truncf %85 : vector<34x8xf32> to vector<34x8xbf16>
    %87 = vector.extract_strided_slice %11 {offsets = [0, 88], sizes = [34, 8], strides = [1, 1]} : vector<34x96xf32> to vector<34x8xf32>
    %88 = arith.truncf %87 : vector<34x8xf32> to vector<34x8xbf16>
    %cst_29 = arith.constant dense<0.000000e+00> : vector<34x34xf32>
    %89 = tpu.matmul %84, %86, %cst_29 {dimension_numbers = #tpu.dot_dimension_numbers<[1], [1], [0], [0], [0, 0, 1, 0], [], []>} : vector<34x8xbf16>, vector<34x8xbf16>, vector<34x34xf32> -> vector<34x34xf32>
    %cst_30 = arith.constant 0.353553385 : f32
    %90 = vector.broadcast %cst_30 : f32 to vector<34x34xf32>
    %91 = arith.mulf %89, %90 : vector<34x34xf32>
    %92 = arith.addf %91, %19 : vector<34x34xf32>
    %cst_31 = arith.constant dense<0xFF800000> : vector<34xf32>
    %93 = vector.multi_reduction <maximumf>, %92, %cst_31 [1] : vector<34x34xf32> to vector<34xf32>
    %94 = vector.shape_cast %93 : vector<34xf32> to vector<34x1xf32>
    %95 = vector.broadcast %94 : vector<34x1xf32> to vector<34x34xf32>
    %96 = arith.subf %92, %95 : vector<34x34xf32>
    %97 = math.exp %96 : vector<34x34xf32>
    %cst_32 = arith.constant dense<0.000000e+00> : vector<34xf32>
    %98 = vector.multi_reduction <add>, %97, %cst_32 [1] : vector<34x34xf32> to vector<34xf32>
    %99 = vector.shape_cast %98 : vector<34xf32> to vector<34x1xf32>
    %100 = vector.broadcast %99 : vector<34x1xf32> to vector<34x34xf32>
    %101 = arith.divf %97, %100 : vector<34x34xf32>
    %102 = arith.truncf %101 : vector<34x34xf32> to vector<34x34xbf16>
    %cst_33 = arith.constant dense<0.000000e+00> : vector<34x8xf32>
    %103 = tpu.matmul %102, %88, %cst_33 {dimension_numbers = #tpu.dot_dimension_numbers<[1], [0], [0], [1], [0, 0, 1, 1], [], []>} : vector<34x34xbf16>, vector<34x8xbf16>, vector<34x8xf32> -> vector<34x8xf32>
    %104 = tpu.concatenate %40, %61, %82, %103 in 1 : vector<34x8xf32>, vector<34x8xf32>, vector<34x8xf32>, vector<34x8xf32> -> vector<34x32xf32>
    %105 = arith.truncf %104 : vector<34x32xf32> to vector<34x32xbf16>
    %c0_34 = arith.constant 0 : index
    %c0_35 = arith.constant 0 : index
    %c0_36 = arith.constant 0 : index
    %106 = vector.load %arg10[%c0_34, %c0_35, %c0_36] : memref<1x32x32xbf16, #tpu.memory_space<vmem>>, vector<1x32x32xbf16>
    %107 = vector.shape_cast %106 : vector<1x32x32xbf16> to vector<32x32xbf16>
    %cst_37 = arith.constant dense<0.000000e+00> : vector<34x32xf32>
    %108 = tpu.matmul %105, %107, %cst_37 {dimension_numbers = #tpu.dot_dimension_numbers<[1], [0], [0], [1], [0, 0, 1, 1], [], []>} : vector<34x32xbf16>, vector<32x32xbf16>, vector<34x32xf32> -> vector<34x32xf32>
    %c0_38 = arith.constant 0 : index
    %c0_39 = arith.constant 0 : index
    %c0_40 = arith.constant 0 : index
    %109 = vector.load %arg11[%c0_38, %c0_39, %c0_40] : memref<1x1x32xf32, #tpu.memory_space<vmem>>, vector<1x1x32xf32>
    %110 = vector.shape_cast %109 : vector<1x1x32xf32> to vector<1x32xf32>
    %111 = vector.broadcast %110 : vector<1x32xf32> to vector<34x32xf32>
    %112 = arith.addf %108, %111 : vector<34x32xf32>
    %113 = arith.addf %3, %112 : vector<34x32xf32>
    %c0_41 = arith.constant 0 : index
    %c0_42 = arith.constant 0 : index
    %c0_43 = arith.constant 0 : index
    %114 = vector.load %arg12[%c0_41, %c0_42, %c0_43] : memref<1x1x32xf32, #tpu.memory_space<vmem>>, vector<1x1x32xf32>
    %115 = vector.shape_cast %114 : vector<1x1x32xf32> to vector<1x32xf32>
    %c0_44 = arith.constant 0 : index
    %c0_45 = arith.constant 0 : index
    %c0_46 = arith.constant 0 : index
    %116 = vector.load %arg13[%c0_44, %c0_45, %c0_46] : memref<1x1x32xf32, #tpu.memory_space<vmem>>, vector<1x1x32xf32>
    %117 = vector.shape_cast %116 : vector<1x1x32xf32> to vector<1x32xf32>
    %cst_47 = arith.constant dense<0.000000e+00> : vector<34xf32>
    %118 = vector.multi_reduction <add>, %113, %cst_47 [1] : vector<34x32xf32> to vector<34xf32>
    %119 = vector.shape_cast %118 : vector<34xf32> to vector<34x1xf32>
    %cst_48 = arith.constant 3.200000e+01 : f32
    %120 = vector.broadcast %cst_48 : f32 to vector<34x1xf32>
    %121 = arith.divf %119, %120 : vector<34x1xf32>
    %122 = vector.broadcast %121 : vector<34x1xf32> to vector<34x32xf32>
    %123 = arith.subf %113, %122 : vector<34x32xf32>
    %124 = arith.mulf %123, %123 : vector<34x32xf32>
    %cst_49 = arith.constant dense<0.000000e+00> : vector<34xf32>
    %125 = vector.multi_reduction <add>, %124, %cst_49 [1] : vector<34x32xf32> to vector<34xf32>
    %126 = vector.shape_cast %125 : vector<34xf32> to vector<34x1xf32>
    %cst_50 = arith.constant 3.200000e+01 : f32
    %127 = vector.broadcast %cst_50 : f32 to vector<34x1xf32>
    %128 = arith.divf %126, %127 : vector<34x1xf32>
    %129 = vector.broadcast %121 : vector<34x1xf32> to vector<34x32xf32>
    %130 = arith.subf %113, %129 : vector<34x32xf32>
    %cst_51 = arith.constant 9.99999974E-6 : f32
    %131 = vector.broadcast %cst_51 : f32 to vector<34x1xf32>
    %132 = arith.addf %128, %131 : vector<34x1xf32>
    %133 = math.rsqrt %132 : vector<34x1xf32>
    %134 = vector.broadcast %133 : vector<34x1xf32> to vector<34x32xf32>
    %135 = arith.mulf %130, %134 : vector<34x32xf32>
    %136 = vector.broadcast %115 : vector<1x32xf32> to vector<34x32xf32>
    %137 = arith.mulf %135, %136 : vector<34x32xf32>
    %138 = vector.broadcast %117 : vector<1x32xf32> to vector<34x32xf32>
    %139 = arith.addf %137, %138 : vector<34x32xf32>
    %140 = arith.truncf %139 : vector<34x32xf32> to vector<34x32xbf16>
    %c0_52 = arith.constant 0 : index
    %c0_53 = arith.constant 0 : index
    %c0_54 = arith.constant 0 : index
    %141 = vector.load %arg14[%c0_52, %c0_53, %c0_54] : memref<1x32x64xbf16, #tpu.memory_space<vmem>>, vector<1x32x64xbf16>
    %142 = vector.shape_cast %141 : vector<1x32x64xbf16> to vector<32x64xbf16>
    %cst_55 = arith.constant dense<0.000000e+00> : vector<34x64xf32>
    %143 = tpu.matmul %140, %142, %cst_55 {dimension_numbers = #tpu.dot_dimension_numbers<[1], [0], [0], [1], [0, 0, 1, 1], [], []>} : vector<34x32xbf16>, vector<32x64xbf16>, vector<34x64xf32> -> vector<34x64xf32>
    %c0_56 = arith.constant 0 : index
    %c0_57 = arith.constant 0 : index
    %c0_58 = arith.constant 0 : index
    %144 = vector.load %arg15[%c0_56, %c0_57, %c0_58] : memref<1x1x64xf32, #tpu.memory_space<vmem>>, vector<1x1x64xf32>
    %145 = vector.shape_cast %144 : vector<1x1x64xf32> to vector<1x64xf32>
    %146 = vector.broadcast %145 : vector<1x64xf32> to vector<34x64xf32>
    %147 = arith.addf %143, %146 : vector<34x64xf32>
    %cst_59 = arith.constant 0.000000e+00 : f32
    %148 = vector.broadcast %cst_59 : f32 to vector<34x64xf32>
    %149 = arith.maximumf %147, %148 : vector<34x64xf32>
    %150 = arith.truncf %149 : vector<34x64xf32> to vector<34x64xbf16>
    %c0_60 = arith.constant 0 : index
    %c0_61 = arith.constant 0 : index
    %c0_62 = arith.constant 0 : index
    %151 = vector.load %arg16[%c0_60, %c0_61, %c0_62] : memref<1x64x32xbf16, #tpu.memory_space<vmem>>, vector<1x64x32xbf16>
    %152 = vector.shape_cast %151 : vector<1x64x32xbf16> to vector<64x32xbf16>
    %cst_63 = arith.constant dense<0.000000e+00> : vector<34x32xf32>
    %153 = tpu.matmul %150, %152, %cst_63 {dimension_numbers = #tpu.dot_dimension_numbers<[1], [0], [0], [1], [0, 0, 1, 1], [], []>} : vector<34x64xbf16>, vector<64x32xbf16>, vector<34x32xf32> -> vector<34x32xf32>
    %c0_64 = arith.constant 0 : index
    %c0_65 = arith.constant 0 : index
    %c0_66 = arith.constant 0 : index
    %154 = vector.load %arg17[%c0_64, %c0_65, %c0_66] : memref<1x1x32xf32, #tpu.memory_space<vmem>>, vector<1x1x32xf32>
    %155 = vector.shape_cast %154 : vector<1x1x32xf32> to vector<1x32xf32>
    %156 = vector.broadcast %155 : vector<1x32xf32> to vector<34x32xf32>
    %157 = arith.addf %153, %156 : vector<34x32xf32>
    %158 = arith.addf %139, %157 : vector<34x32xf32>
    %c0_67 = arith.constant 0 : index
    %c0_68 = arith.constant 0 : index
    %c0_69 = arith.constant 0 : index
    %159 = vector.load %arg18[%c0_67, %c0_68, %c0_69] : memref<1x1x32xf32, #tpu.memory_space<vmem>>, vector<1x1x32xf32>
    %160 = vector.shape_cast %159 : vector<1x1x32xf32> to vector<1x32xf32>
    %c0_70 = arith.constant 0 : index
    %c0_71 = arith.constant 0 : index
    %c0_72 = arith.constant 0 : index
    %161 = vector.load %arg19[%c0_70, %c0_71, %c0_72] : memref<1x1x32xf32, #tpu.memory_space<vmem>>, vector<1x1x32xf32>
    %162 = vector.shape_cast %161 : vector<1x1x32xf32> to vector<1x32xf32>
    %cst_73 = arith.constant dense<0.000000e+00> : vector<34xf32>
    %163 = vector.multi_reduction <add>, %158, %cst_73 [1] : vector<34x32xf32> to vector<34xf32>
    %164 = vector.shape_cast %163 : vector<34xf32> to vector<34x1xf32>
    %cst_74 = arith.constant 3.200000e+01 : f32
    %165 = vector.broadcast %cst_74 : f32 to vector<34x1xf32>
    %166 = arith.divf %164, %165 : vector<34x1xf32>
    %167 = vector.broadcast %166 : vector<34x1xf32> to vector<34x32xf32>
    %168 = arith.subf %158, %167 : vector<34x32xf32>
    %169 = arith.mulf %168, %168 : vector<34x32xf32>
    %cst_75 = arith.constant dense<0.000000e+00> : vector<34xf32>
    %170 = vector.multi_reduction <add>, %169, %cst_75 [1] : vector<34x32xf32> to vector<34xf32>
    %171 = vector.shape_cast %170 : vector<34xf32> to vector<34x1xf32>
    %cst_76 = arith.constant 3.200000e+01 : f32
    %172 = vector.broadcast %cst_76 : f32 to vector<34x1xf32>
    %173 = arith.divf %171, %172 : vector<34x1xf32>
    %174 = vector.broadcast %166 : vector<34x1xf32> to vector<34x32xf32>
    %175 = arith.subf %158, %174 : vector<34x32xf32>
    %cst_77 = arith.constant 9.99999974E-6 : f32
    %176 = vector.broadcast %cst_77 : f32 to vector<34x1xf32>
    %177 = arith.addf %173, %176 : vector<34x1xf32>
    %178 = math.rsqrt %177 : vector<34x1xf32>
    %179 = vector.broadcast %178 : vector<34x1xf32> to vector<34x32xf32>
    %180 = arith.mulf %175, %179 : vector<34x32xf32>
    %181 = vector.broadcast %160 : vector<1x32xf32> to vector<34x32xf32>
    %182 = arith.mulf %180, %181 : vector<34x32xf32>
    %183 = vector.broadcast %162 : vector<1x32xf32> to vector<34x32xf32>
    %184 = arith.addf %182, %183 : vector<34x32xf32>
    %c0_78 = arith.constant 0 : index
    %c0_79 = arith.constant 0 : index
    %185 = vector.load %arg25[%c0_78, %c0_79] : memref<34x32xf32, #tpu.memory_space<vmem>>, vector<34x32xf32>
    tpu.vector_store %arg25[%c0_78, %c0_79], %184 {strides = array<i32>} : memref<34x32xf32, #tpu.memory_space<vmem>>, vector<34x32xf32>,
    %c1_i32 = arith.constant 1 : i32
    %186 = arith.cmpi eq, %arg0, %c1_i32 : i32
    %187 = arith.extui %186 : i1 to i32
    %c0_i32_80 = arith.constant 0 : i32
    %188 = arith.cmpi ne, %187, %c0_i32_80 : i32
    scf.if %188 {
      %189 = vector.extract_strided_slice %184 {offsets = [0, 0], sizes = [2, 32], strides = [1, 1]} : vector<34x32xf32> to vector<2x32xf32>
      %c0_81 = arith.constant 0 : index
      %c0_82 = arith.constant 0 : index
      %190 = vector.load %arg20[%c0_81, %c0_82] : memref<1x32xf32, #tpu.memory_space<vmem>>, vector<1x32xf32>
      %c0_83 = arith.constant 0 : index
      %c0_84 = arith.constant 0 : index
      %191 = vector.load %arg21[%c0_83, %c0_84] : memref<1x32xf32, #tpu.memory_space<vmem>>, vector<1x32xf32>
      %cst_85 = arith.constant dense<0.000000e+00> : vector<2xf32>
      %192 = vector.multi_reduction <add>, %189, %cst_85 [1] : vector<2x32xf32> to vector<2xf32>
      %193 = vector.shape_cast %192 : vector<2xf32> to vector<2x1xf32>
      %cst_86 = arith.constant 3.200000e+01 : f32
      %194 = vector.broadcast %cst_86 : f32 to vector<2x1xf32>
      %195 = arith.divf %193, %194 : vector<2x1xf32>
      %196 = vector.broadcast %195 : vector<2x1xf32> to vector<2x32xf32>
      %197 = arith.subf %189, %196 : vector<2x32xf32>
      %198 = arith.mulf %197, %197 : vector<2x32xf32>
      %cst_87 = arith.constant dense<0.000000e+00> : vector<2xf32>
      %199 = vector.multi_reduction <add>, %198, %cst_87 [1] : vector<2x32xf32> to vector<2xf32>
      %200 = vector.shape_cast %199 : vector<2xf32> to vector<2x1xf32>
      %cst_88 = arith.constant 3.200000e+01 : f32
      %201 = vector.broadcast %cst_88 : f32 to vector<2x1xf32>
      %202 = arith.divf %200, %201 : vector<2x1xf32>
      %203 = vector.broadcast %195 : vector<2x1xf32> to vector<2x32xf32>
      %204 = arith.subf %189, %203 : vector<2x32xf32>
      %cst_89 = arith.constant 9.99999974E-6 : f32
      %205 = vector.broadcast %cst_89 : f32 to vector<2x1xf32>
      %206 = arith.addf %202, %205 : vector<2x1xf32>
      %207 = math.rsqrt %206 : vector<2x1xf32>
      %208 = vector.broadcast %207 : vector<2x1xf32> to vector<2x32xf32>
      %209 = arith.mulf %204, %208 : vector<2x32xf32>
      %210 = vector.broadcast %190 : vector<1x32xf32> to vector<2x32xf32>
      %211 = arith.mulf %209, %210 : vector<2x32xf32>
      %212 = vector.broadcast %191 : vector<1x32xf32> to vector<2x32xf32>
      %213 = arith.addf %211, %212 : vector<2x32xf32>
      %214 = arith.truncf %213 : vector<2x32xf32> to vector<2x32xbf16>
      %c0_90 = arith.constant 0 : index
      %c0_91 = arith.constant 0 : index
      %215 = vector.load %arg22[%c0_90, %c0_91] : memref<32x32xbf16, #tpu.memory_space<vmem>>, vector<32x32xbf16>
      %cst_92 = arith.constant dense<0.000000e+00> : vector<2x32xf32>
      %216 = tpu.matmul %214, %215, %cst_92 {dimension_numbers = #tpu.dot_dimension_numbers<[1], [0], [0], [1], [0, 0, 1, 1], [], []>} : vector<2x32xbf16>, vector<32x32xbf16>, vector<2x32xf32> -> vector<2x32xf32>
      %c0_93 = arith.constant 0 : index
      %c0_94 = arith.constant 0 : index
      %217 = vector.load %arg23[%c0_93, %c0_94] : memref<1x32xf32, #tpu.memory_space<vmem>>, vector<1x32xf32>
      %218 = vector.broadcast %217 : vector<1x32xf32> to vector<2x32xf32>
      %219 = arith.addf %216, %218 : vector<2x32xf32>
      %cst_95 = arith.constant 0.000000e+00 : f32
      %220 = vector.broadcast %cst_95 : f32 to vector<2x32xf32>
      %221 = arith.maximumf %219, %220 : vector<2x32xf32>
      %c0_96 = arith.constant 0 : index
      %c0_97 = arith.constant 0 : index
      %222 = vector.load %arg24[%c0_96, %c0_97] : memref<2x32xf32, #tpu.memory_space<vmem>>, vector<2x32xf32>
      tpu.vector_store %arg24[%c0_96, %c0_97], %221 {strides = array<i32>} : memref<2x32xf32, #tpu.memory_space<vmem>>, vector<2x32xf32>,
    } else {
    }
    return
  }
  func.func @transform_0(%arg0: i32) -> (i32, i32) {
    %c0_i32 = arith.constant 0 : i32
    %c0_i32_0 = arith.constant 0 : i32
    %c0_i32_1 = arith.constant 0 : i32
    return %c0_i32, %c0_i32_0 : i32, i32
  }
  func.func @transform_1(%arg0: i32) -> (i32, i32) {
    %c0_i32 = arith.constant 0 : i32
    %c0_i32_0 = arith.constant 0 : i32
    %c0_i32_1 = arith.constant 0 : i32
    return %c0_i32, %c0_i32_0 : i32, i32
  }
  func.func @transform_2(%arg0: i32) -> (i32, i32) {
    %c0_i32 = arith.constant 0 : i32
    %c0_i32_0 = arith.constant 0 : i32
    %c0_i32_1 = arith.constant 0 : i32
    return %c0_i32, %c0_i32_0 : i32, i32
  }
  func.func @transform_3(%arg0: i32) -> (i32, i32) {
    %c0_i32 = arith.constant 0 : i32
    %c0_i32_0 = arith.constant 0 : i32
    %c0_i32_1 = arith.constant 0 : i32
    return %c0_i32, %c0_i32_0 : i32, i32
  }
  func.func @transform_4(%arg0: i32) -> (i32, i32) {
    %c0_i32 = arith.constant 0 : i32
    %c0_i32_0 = arith.constant 0 : i32
    %c0_i32_1 = arith.constant 0 : i32
    return %c0_i32, %c0_i32_0 : i32, i32
  }
  func.func @transform_5(%arg0: i32) -> (i32, i32) {
    %c0_i32 = arith.constant 0 : i32
    %c0_i32_0 = arith.constant 0 : i32
    %c0_i32_1 = arith.constant 0 : i32
    return %c0_i32, %c0_i32_0 : i32, i32
  }
  func.func @transform_6(%arg0: i32) -> (i32, i32) {
    %c0_i32 = arith.constant 0 : i32
    %c0_i32_0 = arith.constant 0 : i32
    %c0_i32_1 = arith.constant 0 : i32
    return %c0_i32, %c0_i32_0 : i32, i32
  }
  func.func @transform_7(%arg0: i32) -> (i32, i32, i32) {
    %c0_i32 = arith.constant 0 : i32
    %c0_i32_0 = arith.constant 0 : i32
    %c0_i32_1 = arith.constant 0 : i32
    return %arg0, %c0_i32, %c0_i32_0 : i32, i32, i32
  }
  func.func @transform_8(%arg0: i32) -> (i32, i32, i32) {
    %c0_i32 = arith.constant 0 : i32
    %c0_i32_0 = arith.constant 0 : i32
    %c0_i32_1 = arith.constant 0 : i32
    return %arg0, %c0_i32, %c0_i32_0 : i32, i32, i32
  }
  func.func @transform_9(%arg0: i32) -> (i32, i32, i32) {
    %c0_i32 = arith.constant 0 : i32
    %c0_i32_0 = arith.constant 0 : i32
    %c0_i32_1 = arith.constant 0 : i32
    return %arg0, %c0_i32, %c0_i32_0 : i32, i32, i32
  }
  func.func @transform_10(%arg0: i32) -> (i32, i32, i32) {
    %c0_i32 = arith.constant 0 : i32
    %c0_i32_0 = arith.constant 0 : i32
    %c0_i32_1 = arith.constant 0 : i32
    return %arg0, %c0_i32, %c0_i32_0 : i32, i32, i32
  }
  func.func @transform_11(%arg0: i32) -> (i32, i32, i32) {
    %c0_i32 = arith.constant 0 : i32
    %c0_i32_0 = arith.constant 0 : i32
    %c0_i32_1 = arith.constant 0 : i32
    return %arg0, %c0_i32, %c0_i32_0 : i32, i32, i32
  }
  func.func @transform_12(%arg0: i32) -> (i32, i32, i32) {
    %c0_i32 = arith.constant 0 : i32
    %c0_i32_0 = arith.constant 0 : i32
    %c0_i32_1 = arith.constant 0 : i32
    return %arg0, %c0_i32, %c0_i32_0 : i32, i32, i32
  }
  func.func @transform_13(%arg0: i32) -> (i32, i32, i32) {
    %c0_i32 = arith.constant 0 : i32
    %c0_i32_0 = arith.constant 0 : i32
    %c0_i32_1 = arith.constant 0 : i32
    return %arg0, %c0_i32, %c0_i32_0 : i32, i32, i32
  }
  func.func @transform_14(%arg0: i32) -> (i32, i32, i32) {
    %c0_i32 = arith.constant 0 : i32
    %c0_i32_0 = arith.constant 0 : i32
    %c0_i32_1 = arith.constant 0 : i32
    return %arg0, %c0_i32, %c0_i32_0 : i32, i32, i32
  }
  func.func @transform_15(%arg0: i32) -> (i32, i32, i32) {
    %c0_i32 = arith.constant 0 : i32
    %c0_i32_0 = arith.constant 0 : i32
    %c0_i32_1 = arith.constant 0 : i32
    return %arg0, %c0_i32, %c0_i32_0 : i32, i32, i32
  }
  func.func @transform_16(%arg0: i32) -> (i32, i32, i32) {
    %c0_i32 = arith.constant 0 : i32
    %c0_i32_0 = arith.constant 0 : i32
    %c0_i32_1 = arith.constant 0 : i32
    return %arg0, %c0_i32, %c0_i32_0 : i32, i32, i32
  }
  func.func @transform_17(%arg0: i32) -> (i32, i32, i32) {
    %c0_i32 = arith.constant 0 : i32
    %c0_i32_0 = arith.constant 0 : i32
    %c0_i32_1 = arith.constant 0 : i32
    return %arg0, %c0_i32, %c0_i32_0 : i32, i32, i32
  }
  func.func @transform_18(%arg0: i32) -> (i32, i32, i32) {
    %c0_i32 = arith.constant 0 : i32
    %c0_i32_0 = arith.constant 0 : i32
    %c0_i32_1 = arith.constant 0 : i32
    return %arg0, %c0_i32, %c0_i32_0 : i32, i32, i32
  }
  func.func @transform_19(%arg0: i32) -> (i32, i32) {
    %c0_i32 = arith.constant 0 : i32
    %c0_i32_0 = arith.constant 0 : i32
    %c0_i32_1 = arith.constant 0 : i32
    return %c0_i32, %c0_i32_0 : i32, i32
  }
  func.func @transform_20(%arg0: i32) -> (i32, i32) {
    %c0_i32 = arith.constant 0 : i32
    %c0_i32_0 = arith.constant 0 : i32
    %c0_i32_1 = arith.constant 0 : i32
    return %c0_i32, %c0_i32_0 : i32, i32
  }
  func.func @transform_21(%arg0: i32) -> (i32, i32) {
    %c0_i32 = arith.constant 0 : i32
    %c0_i32_0 = arith.constant 0 : i32
    %c0_i32_1 = arith.constant 0 : i32
    return %c0_i32, %c0_i32_0 : i32, i32
  }
  func.func @transform_22(%arg0: i32) -> (i32, i32) {
    %c0_i32 = arith.constant 0 : i32
    %c0_i32_0 = arith.constant 0 : i32
    %c0_i32_1 = arith.constant 0 : i32
    return %c0_i32, %c0_i32_0 : i32, i32
  }
  func.func @transform_23(%arg0: i32) -> (i32, i32) {
    %c0_i32 = arith.constant 0 : i32
    %c0_i32_0 = arith.constant 0 : i32
    %c0_i32_1 = arith.constant 0 : i32
    return %c0_i32, %c0_i32_0 : i32, i32
  }
}

</mosaic_0001>

<bundles_post_ra>
// kernel: vit_forward.1
= control target key start
LH: loop header
LB: loop body
LE: loop exit
PB: predicated region body
PF: predicated region fallthrough
CT: control target
= control target key end

     0   :  { %s4426_s0 = inlined_call_operand.vmem [shape: bf16[32,64], index: 0, kind: input, shape index: {}]   ;;  %s4427_s1 = inlined_call_operand.vmem [shape: bf16[64,32], index: 1, kind: input, shape index: {}]   ;;  %s4428_s2 = inlined_call_operand.vmem [shape: f32[1,32], index: 2, kind: input, shape index: {}]   ;;  %s4429_s3 = inlined_call_operand.vmem [shape: f32[2,32], index: 3, kind: input, shape index: {}]   ;;  %s4430_s4 = inlined_call_operand.vmem [shape: f32[32,32], index: 4, kind: input, shape index: {}]   ;;  %s4431_s5 = inlined_call_operand.vmem [shape: f32[34,1], index: 5, kind: input, shape index: {}]   ;;  %s4432_s6 = inlined_call_operand.vmem [shape: f32[1,34], index: 6, kind: input, shape index: {}]   ;;  %s4433_s7 = inlined_call_operand.vmem [shape: bf16[2,32,96], index: 7, kind: input, shape index: {}]   ;;  %s4434_s8 = inlined_call_operand.vmem [shape: f32[2,1,96], index: 8, kind: input, shape index: {}]   ;;  %s4435_s9 = inlined_call_operand.vmem [shape: bf16[2,32,32], index: 9, kind: input, shape index: {}]   ;;  %s4436_s10 = inlined_call_operand.vmem [shape: f32[2,1,32], index: 10, kind: input, shape index: {}]   ;;  %s4437_s11 = inlined_call_operand.vmem [shape: f32[2,1,32], index: 11, kind: input, shape index: {}]   ;;  %s4438_s12 = inlined_call_operand.vmem [shape: f32[2,1,32], index: 12, kind: input, shape index: {}]   ;;  %s4439_s13 = inlined_call_operand.vmem [shape: bf16[2,32,64], index: 13, kind: input, shape index: {}]   ;;  %s4440_s14 = inlined_call_operand.vmem [shape: f32[2,1,64], index: 14, kind: input, shape index: {}]   ;;  %s4441_s15 = inlined_call_operand.vmem [shape: bf16[2,64,32], index: 15, kind: input, shape index: {}]   ;;  %s4442_s16 = inlined_call_operand.vmem [shape: f32[2,1,32], index: 16, kind: input, shape index: {}]   ;;  %s4443_s17 = inlined_call_operand.vmem [shape: f32[2,1,32], index: 17, kind: input, shape index: {}]   ;;  %s4444_s18 = inlined_call_operand.vmem [shape: f32[2,1,32], index: 18, kind: input, shape index: {}]   ;;  %s4445_s19 = inlined_call_operand.vmem [shape: f32[1,32], index: 19, kind: input, shape index: {}]   ;;  %s4446_s20 = inlined_call_operand.vmem [shape: f32[1,32], index: 20, kind: input, shape index: {}]   ;;  %s4447_s21 = inlined_call_operand.vmem [shape: bf16[32,32], index: 21, kind: input, shape index: {}]   ;;  %s4448_s22 = inlined_call_operand.vmem [shape: f32[1,32], index: 22, kind: input, shape index: {}]   ;;  %s4449_s23 = inlined_call_operand.hbm [shape: f32[2,32], index: 23, kind: output, shape index: {}]  }
   0x1   :  { %4457 = sst [smem:[#allocation7_spill]] %s4426_s0 }
   0x2   :  { %4458 = sst [smem:[#allocation8_spill]] %s4427_s1 }
   0x3   :  { %4459 = sst [smem:[#allocation9_spill]] %s4428_s2 }
   0x4   :  { %4460 = sst [smem:[#allocation10_spill]] %s4429_s3 }
   0x5   :  { %4461 = sst [smem:[#allocation11_spill]] %s4430_s4 }
   0x6   :  { %4462 = sst [smem:[#allocation12_spill]] %s4431_s5 }
   0x7   :  { %4463 = sst [smem:[#allocation13_spill]] %s4432_s6 }
   0x8   :  { %4464 = sst [smem:[#allocation14_spill]] %s4433_s7 }
   0x9   :  { %4465 = sst [smem:[#allocation15_spill]] %s4435_s9 }
   0xa   :  { %4466 = sst [smem:[#allocation16_spill]] %s4445_s19 }
   0xb   :  { %4467 = sst [smem:[#allocation17_spill]] %s4446_s20 }
   0xc   :  { %4468 = sst [smem:[#allocation18_spill]] %s4447_s21 }
   0xd   :  { %4469 = sst [smem:[#allocation19_spill]] %s4448_s22 }
   0xe   :  { %4470 = sst [smem:[#allocation20_spill]] %s4449_s23 }
   0xf   :  { %28 = vsyncpa [#allocation4], 0  ;;  %s3672_s4 = smov 0  }
  0x10 LB: > { %4471 = sst [smem:[#allocation6_spill]] %s3529_s4  ;;  %s3678_s30 = sadd.s32 4294967295, %s3529_s4   ;;  %s3529_s4 = sphi %s3672_s4, %s34_s4  }
  0x11   : > { %p2897_p0 = scmp.ge.s32.totalorder %s3529_s4, 1  ;;  %p727_p1 = scmp.lt.s32.totalorder %s3529_s4, 3 }
  0x13   : > { %p728_p2 = pnand %p2897_p0, %p727_p1 }
  0x14   : > { %p825_p3 = scmp.lt.s32.totalorder (!%p728_p2), %s3678_s30, 1  ;;  %s4472_s27 = sld [smem:[#allocation14_spill]] (!%p728_p2) }
  0x15   : > { %731 = sbr.rel (%p728_p2) target bundleno = 3474 (0xd92), region = 112  ;;  %s4473_s9 = sld [smem:[#allocation15_spill]] (!%p728_p2) }
  0x16   : > { %p2906_p4 = scmp.ne.s32.totalorder (!%p728_p2), %s3678_s30, 0 }
  0x1c   : > { %s3684_s24 = scalar_select %p825_p3, %s3678_s30, 1 }
  0x1d   : > { %873 = sbr.rel (%p2906_p4) target bundleno = 274 (0x112), region = 116  ;;  %s4474_s4 = sld [smem:[#allocation8_spill]] (!%p2906_p4)  ;;  %vm927_vm0 = vcmask (!%p2906_p4), 523264   ;;  %vm988_vm1 = vcmask (!%p2906_p4), 254976   ;;  %vm998_vm2 = vcmask (!%p2906_p4), 261120  }
  0x1e   : > { %s2982_s25 = sshll.u32 %s3684_s24, 4  ;;  %s2985_s21 = sshll.u32 %s3684_s24, 5 }
  0x1f   : > { %s3694_s7 = scalar_lea.vmem %s4472_s27, %s2982_s25  ;;  %s3699_s3 = scalar_lea.vmem %s4473_s9, %s2982_s25 }
  0x20   : > { %s3716_s27 = scalar_lea.vmem %s4439_s13, %s2982_s25  ;;  %s3726_s23 = scalar_lea.vmem %s4441_s15, %s2985_s21 }
  0x21   : > { %s862_s5 = scalar_lea.vmem %s4442_s16, %s3684_s24  ;;  %s865_s2 = scalar_lea.vmem %s4443_s17, %s3684_s24 }
  0x22   : > { %s4476_s25 = sld [smem:[#allocation7_spill]] (!%p2906_p4)  ;;  %s4477_s20 = sld [smem:[#allocation10_spill]] (!%p2906_p4) }
  0x23   : > { %s4475_s0 = smov (!%p2906_p4), %s4474_s4  ;;  %v3336_v0 = vld [vmem:[%s4474_s4] sm:$0xff] (!%p2906_p4)   ;;  %s4478_s1 = sld [smem:[#allocation9_spill]] (!%p2906_p4) }
  0x24   : > { %v3337_v1 = vld [vmem:[%s4475_s0 + $0x8] sm:$0xff]   ;;  %3065 = vmatprep.subr.bf16.mxu0 %v3336_v0  ;;  %v3338_v2 = vld [vmem:[%s4475_s0 + $0x10] sm:$0xff]   ;;  %v3339_v4 = vld [vmem:[%s4475_s0 + $0x18] sm:$0xff]   ;;  %s4479_s19 = sld [smem:[#allocation11_spill]] }
  0x25   : > { %3066 = vmatpush3.bf16.msra.mxu0 %v3336_v0 }
  0x26   : > { %3067 = vmatprep.subr.bf16.mxu0 %v3337_v1 }
  0x28   : > { %v3340_v3 = vld [vmem:[%s4476_s25] sm:$0xff]   ;;  %v3341_v5 = vld [vmem:[%s4476_s25 + $0x8] sm:$0xff]  }
  0x29   : > { %3073 = vmatprep.mubr.msk.bf16.mxu0 %vm927_vm0, %v3340_v3  ;;  %3068 = vmatpush3.bf16.msra.mxu0 %v3337_v1  ;;  %v987_v6 = vld [vmem:[%s4477_s20] sm:$0x3] }
  0x2a   : > { %3069 = vmatprep.subr.bf16.mxu0 %v3338_v2  ;;  %989 = vst.msk [vmem:[#allocation2] sm:$0x3] %vm988_vm1, %v987_v6  ;;  %v2907_v7 = vld [vmem:[%s4478_s1] ss:$0 sm:$0xff]  ;;  %v992_v11 = vld [vmem:[%s4479_s19 + $0x10] sm:$0xff]  ;;  %v993_v19 = vld [vmem:[%s4479_s19 + $0x18] sm:$0xff] }
  0x2b   : > { %v990_v15 = vld [vmem:[%s4479_s19] sm:$0xff]  ;;  %v991_v23 = vld [vmem:[%s4479_s19 + $0x8] sm:$0xff] }
  0x2d   : > { %3070 = vmatpush3.bf16.msra.mxu0 %v3338_v2 }
  0x2e   : > { %3071 = vmatprep.subr.bf16.mxu0 %v3339_v4 }
  0x31   : > { %3072 = vmatpush3.bf16.msra.mxu0 %v3339_v4 }
  0x34   : > { %3074 = vmatmul.mubr.msk.bf16.vlgmr.msra.gmra.mrb[0].mxu0 %vm927_vm0, %v3341_v5 }
 0x107   : > { %v3075_v8 = vpop.f32.mrb[0].mxu0 }
 0x108   : > { %v977_v9 = vadd.f32 %v3075_v8, %v2907_v7  ;;  %v968_v10 = vpop.f32.mrb[1].mxu0 }
 0x109   : > { %v969_v12 = vadd.f32 %v2907_v7, %v968_v10  ;;  %v3076_v13 = vpop.f32.mrb[2].mxu0 }
 0x10a   : > { %v985_v14 = vmax.f32 %v977_v9, 0.0  ;;  %v980_v16 = vadd.f32 %v3076_v13, %v2907_v7  ;;  %v971_v17 = vpop.f32.mrb[3].mxu0 }
 0x10b   : > { %v983_v18 = vmax.f32 %v969_v12, 0.0  ;;  %v972_v20 = vadd.f32 %v2907_v7, %v971_v17 }
 0x10c   : > { %v996_v21 = vadd.f32 %v992_v11, %v985_v14  ;;  %v986_v22 = vmax.f32 %v980_v16, 0.0 }
 0x10d   : > { %v994_v24 = vadd.f32 %v990_v15, %v983_v18  ;;  %v984_v25 = vmax.f32 %v972_v20, 0.0 }
 0x10e   : > { %1001 = vst.msk [vmem:[#allocation2 + $0x12] sm:$0xff] %vm998_vm2, %v996_v21  ;;  %v997_v26 = vadd.f32 %v993_v19, %v986_v22 }
 0x10f   : > { %999 = vst.msk [vmem:[#allocation2 + $0x2] sm:$0xff] %vm998_vm2, %v994_v24  ;;  %v995_v27 = vadd.f32 %v991_v23, %v984_v25 }
 0x110   : > { %1002 = vst.msk [vmem:[#allocation2 + $0x1a] sm:$0xff] %vm998_vm2, %v997_v26 }
 0x111   : > { %1000 = vst.msk [vmem:[#allocation2 + $0xa] sm:$0xff] %vm998_vm2, %v995_v27 }
 0x112 PF: > { %v3374_v28 = vld [vmem:[%s3694_s7] sm:$0xff]   ;;  %v3531_v29 = vmov 0.0   ;;  %v3375_v30 = vld [vmem:[%s3694_s7 + $0x8] sm:$0xff]   ;;  %vm3532_vm3 = vmmov 0   ;;  %vm1034_vm4 = vcmask 261120   ;;  %v3533_v39 = vmov 0   ;;  %s4480_s1 = scalar_lea.vmem %s4434_s8, %s3684_s24 }
 0x113   : > { %3077 = vmatprep.subr.bf16.mxu0 %v3531_v29  ;;  %3093 = vmatprep.subr.bf16.mxu1 %v3531_v29  ;;  %v2916_v40 = vld [vmem:[%s4480_s1] ss:$0 sm:$0xff]  ;;  %s3534_s6 = smov 96   ;;  %s3535_s28 = smov 88   ;;  %vm1159_vm5 = vcmask 64512   ;;  %vm1321_vm6 = vcmask 1040384  }
 0x114   : > { %3078 = vmatpush3.bf16.msra.mxu0 %v3374_v28  ;;  %3081 = vmatprep.mubr.msk.bf16.mxu0 %vm3532_vm3, %v3531_v29  ;;  %s3536_s9 = smov 120   ;;  %s3537_s29 = smov 80   ;;  %vm1244_vm9 = vcmask 277504   ;;  %vm1257_vm13 = vcmask 271360   ;;  %vm2136_vm14 = vcmask 130048   ;;  %vm2142_vm15 = vcmask 195584  }
 0x115   : > { %3079 = vmatprep.subr.bf16.mxu0 %v3531_v29  ;;  %3099 = vmatprep.mubr.msk.bf16.mxu1 %vm3532_vm3, %v3531_v29  ;;  %s3538_s4 = smov 112   ;;  %s3539_s21 = smov 72   ;;  %vm2258_vm0 = vcmask 254976   ;;  %vm2473_vm1 = vcmask 523264  }
 0x116   : > { %v1003_v31 = vld [vmem:[#allocation2] sm:$0xff]  ;;  %3343 = vset.pattern.permute.xlu0 %v3533_v39  ;;  %3342 = vset.pattern.permute.xlu1 %v3533_v39  ;;  %s3540_s20 = smov 104   ;;  %s4481_s22 = sld [smem:[#allocation12_spill]] }
 0x117   : > { %v1006_v35 = vld [vmem:[#allocation2 + $0x18] sm:$0xff]  ;;  %v1007_v37 = vld [vmem:[#allocation2 + $0x20] sm:$0x3]  ;;  %s3541_s26 = smov 64   ;;  %s3542_s1 = smov 56  }
 0x118   : > { %v1004_v32 = vld [vmem:[#allocation2 + $0x8] sm:$0xff]  ;;  %3080 = vmatpush3.bf16.msra.mxu0 %v3375_v30  ;;  %v1005_v34 = vld [vmem:[#allocation2 + $0x10] sm:$0xff]  ;;  %v1010_v38 = vpack.c.bf16 %v1007_v37, %v1007_v37  ;;  %p2971_p5 = scmp.ne.s32.totalorder %s3678_s30, 1 }
 0x119   : > { %v1008_v33 = vpack.c.bf16 %v1004_v32, %v1003_v31  ;;  %3111 = vmatprep.subr.bf16.mxu0 %v3531_v29  ;;  %v1009_v36 = vpack.c.bf16 %v1006_v35, %v1005_v34  ;;  %vm3550_vm2 = vmmov (!%p2971_p5), 0  }
 0x11b   : > { %3082 = vmatmul.mubr.msk.bf16.vlgmr.msra.gmra.mrb[0].mxu0 %vm1034_vm4, %v1008_v33 }
 0x11c   : > { %3085 = vmatprep.mubr.msk.bf16.mxu0 %vm3532_vm3, %v3531_v29  ;;  %v1101_v61 = vld [vmem:[%s4481_s22 + $0x8] sm:$0xff]  ;;  %v1104_v62 = vld [vmem:[%s4481_s22 + $0x20] sm:$0x3]  ;;  %v1102_v0 = vld [vmem:[%s4481_s22 + $0x10] sm:$0xff] }
 0x11d   : > { %v1100_v63 = vld [vmem:[%s4481_s22] sm:$0xff]  ;;  %v1103_v1 = vld [vmem:[%s4481_s22 + $0x18] sm:$0xff] }
 0x123   : > { %3086 = vmatmul.mubr.msk.bf16.gmra.mrb[4].mxu0 %vm1034_vm4, %v1009_v36 }
 0x124   : > { %3089 = vmatprep.mubr.msk.bf16.mxu0 %vm3532_vm3, %v3531_v29 }
 0x12b   : > { %3090 = vmatmul.mubr.msk.bf16.gmra.mrb[8].mxu0 %vm1034_vm4, %v1010_v38 }
 0x12c   : > { %3117 = vmatprep.mubr.msk.bf16.mxu0 %vm3532_vm3, %v3531_v29 }
 0x1ee   : > { %v1078_v41 = vpop.f32.mrb[0].mxu0 }
 0x1ef   : > { %v3083_v42 = vpop.f32.mrb[1].mxu0  ;;  %v1079_v44 = vadd.f32 %v2916_v40, %v1078_v41 }
 0x1f0   : > { %v1081_v43 = vpop.f32.mrb[2].mxu0 }
 0x1f1   : > { %v1082_v45 = vadd.f32 %v2916_v40, %v1081_v43  ;;  %v3084_v46 = vpop.f32.mrb[3].mxu0 }
 0x1f3   : > { %v3801_v47 = vpack.c.bf16 %v1082_v45, %v1079_v44 }
 0x1f5   : > { %1153 = vrot.lane.b32.xlu0 %v3801_v47, %s3534_s6 }
 0x1f6   : > { %v1086_v48 = vpop.f32.mrb[4].mxu0 }
 0x1f7   : > { %v3087_v49 = vpop.f32.mrb[5].mxu0  ;;  %v1087_v51 = vadd.f32 %v2916_v40, %v1086_v48  ;;  %v3543_v48 = vmov -1e+30  }
 0x1f8   : > { %v1089_v50 = vpop.f32.mrb[6].mxu0 }
 0x1f9   : > { %v1090_v52 = vadd.f32 %v2916_v40, %v1089_v50  ;;  %v3088_v53 = vpop.f32.mrb[7].mxu0 }
 0x1fb   : > { %v3804_v54 = vpack.c.bf16 %v1090_v52, %v1087_v51 }
 0x1fd   : > { %1155 = vrot.lane.b32.xlu0 %v3804_v54, %s3534_s6 }
 0x1fe   : > { %v1094_v55 = vpop.f32.mrb[8].mxu0 }
 0x1ff   : > { %v1095_v56 = vadd.f32 %v2916_v40, %v1094_v55  ;;  %v3091_v57 = vpop.f32.mrb[9].mxu0 }
 0x200   : > { %v1097_v58 = vpop.f32.mrb[10].mxu0 }
 0x201   : > { %v3807_v59 = vpack.c.bf16 %v1095_v56, %v1095_v56  ;;  %1389 = vrot.lane.b32.xlu0 %v3804_v54, %s3535_s28  ;;  %v3092_v60 = vpop.f32.mrb[11].mxu0 }
 0x203   : > { %1157 = vrot.lane.b32.xlu1 %v3807_v59, %s3534_s6  ;;  %s4484_s6 = scalar_lea.vmem %s4437_s11, %s3684_s24 }
 0x205   : > { %1381 = vrot.lane.b32.xlu0 %v3801_v47, %s3536_s9 }
 0x207   : > { %1387 = vrot.lane.b32.xlu1 %v3801_v47, %s3535_s28 }
 0x209   : > { %1383 = vrot.lane.b32.xlu0 %v3804_v54, %s3536_s9 }
 0x20b   : > { %1391 = vrot.lane.b32.xlu1 %v3807_v59, %s3535_s28  ;;  %s4482_s28 = sld [smem:[#allocation13_spill]] }
 0x20d   : > { %1385 = vrot.lane.b32.xlu0 %v3807_v59, %s3536_s9  ;;  %s3544_s9 = smov 48  }
 0x20f   : > { %1617 = vrot.lane.b32.xlu1 %v3801_v47, %s3537_s29 }
 0x211   : > { %1611 = vrot.lane.b32.xlu0 %v3801_v47, %s3538_s4  ;;  %v2922_v46 = vld [vmem:[%s4482_s28] ss:$0 sm:$0xff] }
 0x213   : > { %1619 = vrot.lane.b32.xlu1 %v3804_v54, %s3537_s29 }
 0x215   : > { %1613 = vrot.lane.b32.xlu0 %v3804_v54, %s3538_s4 }
 0x217   : > { %1621 = vrot.lane.b32.xlu1 %v3807_v59, %s3537_s29  ;;  %s3545_s29 = smov 40  }
 0x219   : > { %1615 = vrot.lane.b32.xlu0 %v3807_v59, %s3538_s4  ;;  %s3546_s4 = smov 8  }
 0x21b   : > { %1847 = vrot.lane.b32.xlu1 %v3801_v47, %s3539_s21 }
 0x21d   : > { %1841 = vrot.lane.b32.xlu0 %v3801_v47, %s3540_s20 }
 0x21f   : > { %1849 = vrot.lane.b32.xlu1 %v3804_v54, %s3539_s21 }
 0x221   : > { %1845 = vrot.lane.b32.xlu0 %v3807_v59, %s3540_s20 }
 0x223   : > { %1851 = vrot.lane.b32.xlu1 %v3807_v59, %s3539_s21  ;;  %s3548_s21 = smov 24  }
 0x225   : > { %1113 = vperm.xlu0 %3343, %v1101_v61  }
 0x227   : > { %1843 = vrot.lane.b32.xlu1 %v3804_v54, %s3540_s20  ;;  %s4487_s20 = scalar_lea.vmem %s4444_s18, %s3684_s24 }
 0x229   : > { %1128 = vperm.xlu0 %3343, %v1104_v62  }
 0x22b   : > { %1108 = vperm.xlu1 %3342, %v1100_v63  }
 0x22d   : > { %1306 = vrot.lane.b32.xlu0 %v3804_v54, %s3541_s26 }
 0x22f   : > { %1118 = vperm.xlu1 %3342, %v1102_v0  }
 0x231   : > { %1535 = vrot.lane.b32.xlu0 %v3801_v47, %s3542_s1 }
 0x233   : > { %1123 = vperm.xlu1 %3342, %v1103_v1  }
 0x237   : > { %1304 = vrot.lane.b32.xlu1 %v3801_v47, %s3541_s26 }
 0x23b   : > { %1537 = vrot.lane.b32.xlu1 %v3804_v54, %s3542_s1 }
 0x23f   : > { %1308 = vrot.lane.b32.xlu1 %v3807_v59, %s3541_s26  ;;  %s3547_s26 = smov 16  }
 0x267   : > { %v1154_v2 = vpop.permute.xlu0 %1153 }
 0x268   : > { %v1170_v3 = vsel %vm1159_vm5, %v1154_v2, 0 }
 0x269   : > { %3094 = vmatpush3.bf16.xpose.msra.mxu1 %v1170_v3 }
 0x26a   : > { %3095 = vmatprep.subr.bf16.mxu1 %v3531_v29 }
 0x26f   : > { %v1156_v4 = vpop.permute.xlu0 %1155 }
 0x270   : > { %v1173_v5 = vsel %vm1159_vm5, %v1156_v4, 0 }
 0x271   : > { %3096 = vmatpush3.bf16.xpose.msra.mxu1 %v1173_v5 }
 0x272   : > { %3097 = vmatprep.subr.bf16.mxu1 %v3531_v29 }
 0x273   : > { %v1390_v9 = vpop.permute.xlu0 %1389 }
 0x274   : > { %v1406_v15 = vsel %vm1159_vm5, %v1390_v9, 0 }
 0x275   : > { %v1158_v6 = vpop.permute.xlu1 %1157 }
 0x276   : > { %v1176_v7 = vsel %vm1159_vm5, %v1158_v6, 0 }
 0x277   : > { %v1382_v11 = vpop.permute.xlu0 %1381 }
 0x279   : > { %3098 = vmatpush3.bf16.xpose.msra.mxu1 %v1176_v7  ;;  %v1388_v8 = vpop.permute.xlu1 %1387 }
 0x27a   : > { %3129 = vmatprep.subr.bf16.mxu1 %v3531_v29  ;;  %v1403_v12 = vsel %vm1159_vm5, %v1388_v8, 0 }
 0x27b   : > { %v1384_v14 = vpop.permute.xlu0 %1383 }
 0x27d   : > { %v1392_v10 = vpop.permute.xlu1 %1391 }
 0x27e   : > { %v1409_v19 = vsel %vm1159_vm5, %v1392_v10, 0 }
 0x27f   : > { %v1386_v17 = vpop.permute.xlu0 %1385 }
 0x280   : > { %3100 = vmatmul.mubr.msk.bf16.vlgmr.msra.gmra.mrb[0].mxu1 %vm1159_vm5, %v3801_v47 }
 0x281   : > { %3130 = vmatpush3.bf16.xpose.msra.mxu1 %v1403_v12  ;;  %3103 = vmatprep.mubr.msk.bf16.mxu1 %vm3532_vm3, %v3531_v29  ;;  %v1618_v13 = vpop.permute.xlu1 %1617 }
 0x282   : > { %3131 = vmatprep.subr.bf16.mxu1 %v3531_v29  ;;  %v1633_v22 = vsel %vm1159_vm5, %v1618_v13, 0 }
 0x283   : > { %v1612_v20 = vpop.permute.xlu0 %1611 }
 0x285   : > { %v1620_v16 = vpop.permute.xlu1 %1619 }
 0x286   : > { %v1636_v26 = vsel %vm1159_vm5, %v1620_v16, 0 }
 0x287   : > { %v1614_v23 = vpop.permute.xlu0 %1613 }
 0x288   : > { %3104 = vmatmul.mubr.msk.bf16.gmra.mrb[4].mxu1 %vm1159_vm5, %v3804_v54 }
 0x289   : > { %3132 = vmatpush3.bf16.xpose.msra.mxu1 %v1406_v15  ;;  %3107 = vmatprep.mubr.msk.bf16.mxu1 %vm3532_vm3, %v3531_v29  ;;  %v1622_v18 = vpop.permute.xlu1 %1621 }
 0x28a   : > { %3133 = vmatprep.subr.bf16.mxu1 %v3531_v29  ;;  %v1639_v31 = vsel %vm1159_vm5, %v1622_v18, 0 }
 0x28b   : > { %v1616_v25 = vpop.permute.xlu0 %1615 }
 0x28d   : > { %v1848_v21 = vpop.permute.xlu1 %1847 }
 0x28e   : > { %v1863_v36 = vsel %vm1159_vm5, %v1848_v21, 0 }
 0x28f   : > { %v1842_v28 = vpop.permute.xlu0 %1841 }
 0x290   : > { %3108 = vmatmul.mubr.msk.bf16.gmra.mrb[8].mxu1 %vm1159_vm5, %v3807_v59 }
 0x291   : > { %3134 = vmatpush3.bf16.xpose.msra.mxu1 %v1409_v19  ;;  %3135 = vmatprep.mubr.msk.bf16.mxu1 %vm3532_vm3, %v3531_v29  ;;  %v1850_v24 = vpop.permute.xlu1 %1849 }
 0x292   : > { %3165 = vmatprep.subr.bf16.mxu1 %v3531_v29  ;;  %v1866_v40 = vsel %vm1159_vm5, %v1850_v24, 0 }
 0x293   : > { %v1846_v32 = vpop.permute.xlu0 %1845 }
 0x295   : > { %v1852_v27 = vpop.permute.xlu1 %1851 }
 0x296   : > { %v1869_v45 = vsel %vm1159_vm5, %v1852_v27, 0 }
 0x298   : > { %3136 = vmatmul.mubr.msk.bf16.vlgmr.msra.gmra.mrb[12].mxu1 %vm1159_vm5, %v1382_v11 }
 0x299   : > { %3166 = vmatpush3.bf16.xpose.msra.mxu1 %v1633_v22  ;;  %3139 = vmatprep.mubr.msk.bf16.mxu1 %vm3532_vm3, %v3531_v29  ;;  %v1844_v30 = vpop.permute.xlu1 %1843 }
 0x29a   : > { %3167 = vmatprep.subr.bf16.mxu1 %v3531_v29 }
 0x2a0   : > { %3140 = vmatmul.mubr.msk.bf16.gmra.mrb[16].mxu1 %vm1159_vm5, %v1384_v14 }
 0x2a1   : > { %3168 = vmatpush3.bf16.xpose.msra.mxu1 %v1636_v26  ;;  %3143 = vmatprep.mubr.msk.bf16.mxu1 %vm3532_vm3, %v3531_v29 }
 0x2a2   : > { %3169 = vmatprep.subr.bf16.mxu1 %v3531_v29 }
 0x2a4   : > { %v1114_v34 = vpop.permute.xlu0 %1113 }
 0x2a5   : > { %vm1138_vm8 = vcmp.eq.f32.partialorder %v1114_v34, %v2922_v46 }
 0x2a6   : > { %v3926_v53 = vsel %vm1138_vm8, 0.0, %v3543_v48 }
 0x2a8   : > { %3144 = vmatmul.mubr.msk.bf16.gmra.mrb[20].mxu1 %vm1159_vm5, %v1386_v17  ;;  %v3894_v38 = vpop.permute.xlu0 %1128 }
 0x2a9   : > { %3170 = vmatpush3.bf16.xpose.msra.mxu1 %v1639_v31  ;;  %3171 = vmatprep.mubr.msk.bf16.mxu1 %vm3532_vm3, %v3531_v29  ;;  %vm1141_vm12 = vcmp.eq.f32.partialorder %v3894_v38, %v2922_v46 }
 0x2aa   : > { %v1109_v33 = vpop.permute.xlu1 %1108  ;;  %3201 = vmatprep.subr.bf16.mxu1 %v3531_v29  ;;  %v3953_v11 = vsel %vm1141_vm12, 0.0, %v3543_v48 }
 0x2ab   : > { %vm1137_vm7 = vcmp.eq.f32.partialorder %v1109_v33, %v2922_v46 }
 0x2ac   : > { %v1307_v41 = vpop.permute.xlu0 %1306  ;;  %v3924_v49 = vsel %vm1137_vm7, 0.0, %v3543_v48 }
 0x2ae   : > { %v1119_v35 = vpop.permute.xlu1 %1118 }
 0x2af   : > { %vm1139_vm10 = vcmp.eq.f32.partialorder %v1119_v35, %v2922_v46 }
 0x2b0   : > { %3172 = vmatmul.mubr.msk.bf16.vlgmr.msra.gmra.mrb[24].mxu1 %vm1159_vm5, %v1612_v20  ;;  %v3938_v63 = vsel %vm1139_vm10, 0.0, %v3543_v48 }
 0x2b1   : > { %3202 = vmatpush3.bf16.xpose.msra.mxu1 %v1863_v36  ;;  %3175 = vmatprep.mubr.msk.bf16.mxu1 %vm3532_vm3, %v3531_v29 }
 0x2b2   : > { %v1124_v37 = vpop.permute.xlu1 %1123  ;;  %3203 = vmatprep.subr.bf16.mxu1 %v3531_v29 }
 0x2b3   : > { %vm1140_vm11 = vcmp.eq.f32.partialorder %v1124_v37, %v2922_v46 }
 0x2b4   : > { %v3940_v3 = vsel %vm1140_vm11, 0.0, %v3543_v48 }
 0x2b6   : > { %v1305_v39 = vpop.permute.xlu1 %1304 }
 0x2b7   : > { %3112 = vmatpush3.bf16.msra.mxu0 %v1305_v39 }
 0x2b8   : > { %3176 = vmatmul.mubr.msk.bf16.gmra.mrb[28].mxu1 %vm1159_vm5, %v1614_v23  ;;  %3113 = vmatprep.subr.bf16.mxu0 %v3531_v29 }
 0x2b9   : > { %3204 = vmatpush3.bf16.xpose.msra.mxu1 %v1866_v40  ;;  %3179 = vmatprep.mubr.msk.bf16.mxu1 %vm3532_vm3, %v3531_v29 }
 0x2ba   : > { %v3901_v42 = vpop.permute.xlu1 %1537  ;;  %3205 = vmatprep.subr.bf16.mxu1 %v3531_v29 }
 0x2bb   : > { %3114 = vmatpush3.bf16.msra.mxu0 %v1307_v41 }
 0x2bc   : > { %3115 = vmatprep.subr.bf16.mxu0 %v3531_v29 }
 0x2be   : > { %v1309_v43 = vpop.permute.xlu1 %1308 }
 0x2bf   : > { %v1323_v44 = vsel %vm1321_vm6, %v1309_v43, 0 }
 0x2c0   : > { %3116 = vmatpush3.bf16.msra.mxu0 %v1323_v44  ;;  %3180 = vmatmul.mubr.msk.bf16.gmra.mrb[32].mxu1 %vm1159_vm5, %v1616_v25 }
 0x2c1   : > { %3206 = vmatpush3.bf16.xpose.msra.mxu1 %v1869_v45  ;;  %3207 = vmatprep.mubr.msk.bf16.mxu1 %vm3532_vm3, %v3531_v29 }
 0x2c2   : > { %3147 = vmatprep.subr.bf16.mxu0 %v3531_v29  ;;  %3297 = vmatprep.subr.bf16.mxu1 %v3531_v29 }
 0x2c8   : > { %3208 = vmatmul.mubr.msk.bf16.vlgmr.msra.gmra.mrb[36].mxu1 %vm1159_vm5, %v1842_v28 }
 0x2c9   : > { %3211 = vmatprep.mubr.msk.bf16.mxu1 %vm3532_vm3, %v3531_v29 }
 0x2d0   : > { %3212 = vmatmul.mubr.msk.bf16.gmra.mrb[40].mxu1 %vm1159_vm5, %v1844_v30 }
 0x2d1   : > { %3215 = vmatprep.mubr.msk.bf16.mxu1 %vm3532_vm3, %v3531_v29 }
 0x2d8   : > { %3216 = vmatmul.mubr.msk.bf16.gmra.mrb[44].mxu1 %vm1159_vm5, %v1846_v32 }
 0x2d9   : > { %3245 = vmatprep.mubr.msk.bf16.mxu1 %vm3532_vm3, %v3531_v29 }
 0x353   : > { %v1212_v50 = vpop.f32.mrb[0].mxu1 }
 0x354   : > { %v1234_v51 = vmul.f32 0.35355338, %v1212_v50  ;;  %v3101_v52 = vpop.f32.mrb[1].mxu1 }
 0x355   : > { %v1215_v55 = vpop.f32.mrb[2].mxu1 }
 0x356   : > { %v1235_v56 = vmul.f32 0.35355338, %v1215_v55  ;;  %v3102_v57 = vpop.f32.mrb[3].mxu1  ;;  %v3929_v58 = vadd.f32 %v1234_v51, %v3924_v49 }
 0x358   : > { %v1245_v60 = vsel %vm1244_vm9, %v3929_v58, -inf  ;;  %v3934_v61 = vadd.f32 %v1235_v56, %v3926_v53 }
 0x359   : > { %1246 = vmax.xlane.f32.xlu1 %v1245_v60 }
 0x35a   : > { %v1248_v62 = vsel %vm1244_vm9, %v3934_v61, -inf }
 0x35b   : > { %1249 = vmax.xlane.f32.xlu0 %v1248_v62  ;;  %v1220_v0 = vpop.f32.mrb[4].mxu1 }
 0x35c   : > { %v1236_v1 = vmul.f32 0.35355338, %v1220_v0  ;;  %v3105_v2 = vpop.f32.mrb[5].mxu1 }
 0x35d   : > { %v1223_v4 = vpop.f32.mrb[6].mxu1 }
 0x35e   : > { %v1237_v5 = vmul.f32 0.35355338, %v1223_v4  ;;  %v3106_v6 = vpop.f32.mrb[7].mxu1  ;;  %v3943_v7 = vadd.f32 %v1236_v1, %v3938_v63 }
 0x360   : > { %v1251_v8 = vsel %vm1244_vm9, %v3943_v7, -inf  ;;  %v3949_v9 = vadd.f32 %v1237_v5, %v3940_v3 }
 0x361   : > { %1252 = vmax.xlane.f32.xlu0 %v1251_v8 }
 0x362   : > { %v1254_v10 = vsel %vm1244_vm9, %v3949_v9, -inf }
 0x363   : > { %v1228_v12 = vpop.f32.mrb[8].mxu1  ;;  %1255 = vmax.xlane.f32.xlu1 %v1254_v10 }
 0x364   : > { %v1238_v13 = vmul.f32 0.35355338, %v1228_v12  ;;  %v3109_v14 = vpop.f32.mrb[9].mxu1 }
 0x365   : > { %v1231_v15 = vpop.f32.mrb[10].mxu1 }
 0x366   : > { %v3110_v16 = vpop.f32.mrb[11].mxu1  ;;  %v3956_v17 = vadd.f32 %v1238_v13, %v3953_v11 }
 0x368   : > { %v1258_v18 = vsel %vm1257_vm13, %v3956_v17, -inf }
 0x369   : > { %1259 = vmax.xlane.f32.xlu0 %v1258_v18 }
 0x36b   : > { %v1445_v19 = vpop.f32.mrb[12].mxu1 }
 0x36c   : > { %v1467_v20 = vmul.f32 0.35355338, %v1445_v19  ;;  %v3137_v21 = vpop.f32.mrb[13].mxu1 }
 0x36d   : > { %v1448_v22 = vpop.f32.mrb[14].mxu1 }
 0x36e   : > { %v1468_v23 = vmul.f32 0.35355338, %v1448_v22  ;;  %v3138_v24 = vpop.f32.mrb[15].mxu1  ;;  %v3961_v25 = vadd.f32 %v1467_v20, %v3924_v49 }
 0x370   : > { %v1477_v26 = vsel %vm1244_vm9, %v3961_v25, -inf  ;;  %v3966_v27 = vadd.f32 %v1468_v23, %v3926_v53 }
 0x371   : > { %1478 = vmax.xlane.f32.xlu1 %v1477_v26 }
 0x372   : > { %v1480_v28 = vsel %vm1244_vm9, %v3966_v27, -inf }
 0x373   : > { %v1453_v30 = vpop.f32.mrb[16].mxu1  ;;  %1481 = vmax.xlane.f32.xlu0 %v1480_v28 }
 0x374   : > { %v1469_v31 = vmul.f32 0.35355338, %v1453_v30  ;;  %v3141_v32 = vpop.f32.mrb[17].mxu1 }
 0x375   : > { %v1456_v33 = vpop.f32.mrb[18].mxu1 }
 0x376   : > { %v1470_v34 = vmul.f32 0.35355338, %v1456_v33  ;;  %v3142_v35 = vpop.f32.mrb[19].mxu1  ;;  %v3971_v36 = vadd.f32 %v1469_v31, %v3938_v63 }
 0x378   : > { %v1483_v37 = vsel %vm1244_vm9, %v3971_v36, -inf  ;;  %v3976_v38 = vadd.f32 %v1470_v34, %v3940_v3 }
 0x379   : > { %1484 = vmax.xlane.f32.xlu1 %v1483_v37 }
 0x37a   : > { %v1486_v39 = vsel %vm1244_vm9, %v3976_v38, -inf }
 0x37b   : > { %v1461_v40 = vpop.f32.mrb[20].mxu1  ;;  %1487 = vmax.xlane.f32.xlu0 %v1486_v39 }
 0x37c   : > { %v1471_v41 = vmul.f32 0.35355338, %v1461_v40  ;;  %v3145_v43 = vpop.f32.mrb[21].mxu1 }
 0x37d   : > { %v1464_v44 = vpop.f32.mrb[22].mxu1 }
 0x37e   : > { %v3146_v45 = vpop.f32.mrb[23].mxu1  ;;  %v3981_v46 = vadd.f32 %v1471_v41, %v3953_v11 }
 0x380   : > { %v1489_v48 = vsel %vm1257_vm13, %v3981_v46, -inf }
 0x381   : > { %1490 = vmax.xlane.f32.xlu1 %v1489_v48 }
 0x383   : > { %v1675_v50 = vpop.f32.mrb[24].mxu1 }
 0x384   : > { %v1697_v51 = vmul.f32 0.35355338, %v1675_v50  ;;  %v3173_v52 = vpop.f32.mrb[25].mxu1 }
 0x385   : > { %v1678_v55 = vpop.f32.mrb[26].mxu1 }
 0x386   : > { %v1698_v56 = vmul.f32 0.35355338, %v1678_v55  ;;  %v3174_v57 = vpop.f32.mrb[27].mxu1  ;;  %v3986_v60 = vadd.f32 %v1697_v51, %v3924_v49 }
 0x388   : > { %v1707_v62 = vsel %vm1244_vm9, %v3986_v60, -inf  ;;  %v3991_v0 = vadd.f32 %v1698_v56, %v3926_v53 }
 0x389   : > { %1708 = vmax.xlane.f32.xlu0 %v1707_v62 }
 0x38a   : > { %v1710_v1 = vsel %vm1244_vm9, %v3991_v0, -inf }
 0x38b   : > { %v1683_v2 = vpop.f32.mrb[28].mxu1  ;;  %1711 = vmax.xlane.f32.xlu1 %v1710_v1 }
 0x38c   : > { %v3177_v4 = vpop.f32.mrb[29].mxu1  ;;  %v1699_v30 = vmul.f32 0.35355338, %v1683_v2 }
 0x38d   : > { %v1686_v5 = vpop.f32.mrb[30].mxu1 }
 0x38e   : > { %v3178_v6 = vpop.f32.mrb[31].mxu1  ;;  %v1700_v31 = vmul.f32 0.35355338, %v1686_v5  ;;  %v4000_v33 = vadd.f32 %v1699_v30, %v3938_v63 }
 0x390   : > { %v4003_v35 = vadd.f32 %v1700_v31, %v3940_v3  ;;  %v1713_v39 = vsel %vm1244_vm9, %v4000_v33, -inf }
 0x392   : > { %v1716_v43 = vsel %vm1244_vm9, %v4003_v35, -inf }
 0x393   : > { %v1691_v8 = vpop.f32.mrb[32].mxu1 }
 0x394   : > { %v3181_v10 = vpop.f32.mrb[33].mxu1  ;;  %v1701_v32 = vmul.f32 0.35355338, %v1691_v8 }
 0x395   : > { %v1694_v12 = vpop.f32.mrb[34].mxu1 }
 0x396   : > { %v3182_v13 = vpop.f32.mrb[35].mxu1  ;;  %v4008_v40 = vadd.f32 %v1701_v32, %v3953_v11 }
 0x398   : > { %v1719_v48 = vsel %vm1257_vm13, %v4008_v40, -inf }
 0x39b   : > { %v1905_v14 = vpop.f32.mrb[36].mxu1 }
 0x39c   : > { %v3209_v15 = vpop.f32.mrb[37].mxu1  ;;  %1539 = vrot.lane.b32.xlu1 %v3807_v59, %s3542_s1  ;;  %v1927_v34 = vmul.f32 0.35355338, %v1905_v14  ;;  %s4483_s1 = scalar_lea.vmem %s4436_s10, %s3684_s24 }
 0x39d   : > { %v1908_v16 = vpop.f32.mrb[38].mxu1 }
 0x39e   : > { %v3210_v18 = vpop.f32.mrb[39].mxu1  ;;  %v1928_v37 = vmul.f32 0.35355338, %v1908_v16  ;;  %v4013_v44 = vadd.f32 %v1927_v34, %v3924_v49 }
 0x39f   : > { %1765 = vrot.lane.b32.xlu0 %v3801_v47, %s3544_s9 }
 0x3a0   : > { %v4018_v50 = vadd.f32 %v1928_v37, %v3926_v53  ;;  %v1937_v52 = vsel %vm1244_vm9, %v4013_v44, -inf }
 0x3a2   : > { %v1940_v49 = vsel %vm1244_vm9, %v4018_v50, -inf }
 0x3a3   : > { %v1913_v19 = vpop.f32.mrb[40].mxu1 }
 0x3a4   : > { %v3213_v20 = vpop.f32.mrb[41].mxu1  ;;  %v1929_v41 = vmul.f32 0.35355338, %v1913_v19 }
 0x3a5   : > { %v1916_v21 = vpop.f32.mrb[42].mxu1 }
 0x3a6   : > { %v3214_v22 = vpop.f32.mrb[43].mxu1  ;;  %v1930_v45 = vmul.f32 0.35355338, %v1916_v21  ;;  %v4023_v55 = vadd.f32 %v1929_v41, %v3938_v63 }
 0x3a8   : > { %v4028_v56 = vadd.f32 %v1930_v45, %v3940_v3  ;;  %v1943_v53 = vsel %vm1244_vm9, %v4023_v55, -inf  ;;  %v4041_v3 = vpop.permute.xlu0 %1535 }
 0x3aa   : > { %v1946_v62 = vsel %vm1244_vm9, %v4028_v56, -inf }
 0x3ab   : > { %v1921_v23 = vpop.f32.mrb[44].mxu1 }
 0x3ac   : > { %v3217_v24 = vpop.f32.mrb[45].mxu1  ;;  %v1931_v51 = vmul.f32 0.35355338, %v1921_v23 }
 0x3ad   : > { %v1924_v26 = vpop.f32.mrb[46].mxu1 }
 0x3ae   : > { %v3218_v28 = vpop.f32.mrb[47].mxu1  ;;  %v4033_v57 = vadd.f32 %v1931_v51, %v3953_v11 }
 0x3b0   : > { %v1949_v63 = vsel %vm1257_vm13, %v4033_v57, -inf }
 0x3be   : > { %1714 = vmax.xlane.f32.xlu0 %v1713_v39 }
 0x3c0   : > { %1717 = vmax.xlane.f32.xlu1 %v1716_v43 }
 0x3c2   : > { %1720 = vmax.xlane.f32.xlu0 %v1719_v48 }
 0x3c4   : > { %1938 = vmax.xlane.f32.xlu1 %v1937_v52 }
 0x3c6   : > { %1941 = vmax.xlane.f32.xlu0 %v1940_v49 }
 0x3c8   : > { %1944 = vmax.xlane.f32.xlu1 %v1943_v53 }
 0x3ca   : > { %1947 = vmax.xlane.f32.xlu0 %v1946_v62 }
 0x3cc   : > { %1950 = vmax.xlane.f32.xlu1 %v1949_v63 }
 0x3e0   : > { %1767 = vrot.lane.b32.xlu0 %v3804_v54, %s3544_s9 }
 0x3e6   : > { %v1247_v1 = vpop.xlane.xlu1 %1246 }
 0x3e7   : > { %v1261_v2 = vsub.f32 %v3929_v58, %v1247_v1 }
 0x3e8   : > { %v1250_v4 = vpop.xlane.xlu0 %1249 }
 0x3e9   : > { %v1266_v11 = vmul.f32 1.442695, %v1261_v2  ;;  %v1262_v5 = vsub.f32 %v3934_v61, %v1250_v4 }
 0x3eb   : > { %3384 = vpow2.f32 %v1266_v11  ;;  %v1268_v6 = vmul.f32 1.442695, %v1262_v5 }
 0x3ed   : > { %3386 = vpow2.f32 %v1268_v6 }
 0x3ee   : > { %v1253_v8 = vpop.xlane.xlu0 %1252 }
 0x3ef   : > { %v1263_v10 = vsub.f32 %v3943_v7, %v1253_v8 }
 0x3f0   : > { %v1256_v12 = vpop.xlane.xlu1 %1255 }
 0x3f1   : > { %v1270_v13 = vmul.f32 1.442695, %v1263_v10  ;;  %v1264_v14 = vsub.f32 %v3949_v9, %v1256_v12 }
 0x3f3   : > { %v1272_v15 = vmul.f32 1.442695, %v1264_v14  ;;  %3388 = vpow2.f32 %v1270_v13 }
 0x3f5   : > { %v4047_v16 = vpop.eup %3384  ;;  %3390 = vpow2.f32 %v1272_v15 }
 0x3f6   : > { %v1260_v58 = vpop.xlane.xlu0 %1259  ;;  %v1276_v18 = vsel %vm1244_vm9, %v4047_v16, 0.0 }
 0x3f7   : > { %v1265_v61 = vsub.f32 %v3956_v17, %v1260_v58  ;;  %1277 = vadd.xlane.f32.xlu1 %v1276_v18  ;;  %v4052_v20 = vpop.eup %3386 }
 0x3f8   : > { %v1279_v9 = vsel %vm1244_vm9, %v4052_v20, 0.0 }
 0x3f9   : > { %v1274_v19 = vmul.f32 1.442695, %v1265_v61 }
 0x3fb   : > { %3392 = vpow2.f32 %v1274_v19 }
 0x3fd   : > { %v4054_v7 = vpop.eup %3388 }
 0x3fe   : > { %v1479_v21 = vpop.xlane.xlu1 %1478  ;;  %v1282_v30 = vsel %vm1244_vm9, %v4054_v7, 0.0 }
 0x3ff   : > { %v4058_v22 = vpop.eup %3390  ;;  %v1492_v23 = vsub.f32 %v3961_v25, %v1479_v21  ;;  %1280 = vadd.xlane.f32.xlu0 %v1279_v9 }
 0x400   : > { %v1482_v24 = vpop.xlane.xlu0 %1481  ;;  %v1285_v17 = vsel %vm1244_vm9, %v4058_v22, 0.0 }
 0x401   : > { %v1497_v26 = vmul.f32 1.442695, %v1492_v23  ;;  %v1493_v28 = vsub.f32 %v3966_v27, %v1482_v24  ;;  %1286 = vadd.xlane.f32.xlu1 %v1285_v17 }
 0x403   : > { %3394 = vpow2.f32 %v1497_v26  ;;  %v1499_v31 = vmul.f32 1.442695, %v1493_v28  ;;  %1283 = vadd.xlane.f32.xlu0 %v1282_v30 }
 0x405   : > { %v4066_v32 = vpop.eup %3392  ;;  %3396 = vpow2.f32 %v1499_v31 }
 0x406   : > { %v1485_v34 = vpop.xlane.xlu1 %1484  ;;  %v1288_v25 = vsel %vm1257_vm13, %v4066_v32, 0.0 }
 0x407   : > { %v1494_v37 = vsub.f32 %v3971_v36, %v1485_v34  ;;  %1289 = vadd.xlane.f32.xlu0 %v1288_v25 }
 0x408   : > { %v1488_v39 = vpop.xlane.xlu0 %1487 }
 0x409   : > { %v1501_v41 = vmul.f32 1.442695, %v1494_v37  ;;  %v1495_v27 = vsub.f32 %v3976_v38, %v1488_v39 }
 0x40b   : > { %3398 = vpow2.f32 %v1501_v41  ;;  %v1503_v43 = vmul.f32 1.442695, %v1495_v27 }
 0x40d   : > { %v4072_v45 = vpop.eup %3394  ;;  %3400 = vpow2.f32 %v1503_v43 }
 0x40e   : > { %v1491_v48 = vpop.xlane.xlu1 %1490  ;;  %v1507_v51 = vsel %vm1244_vm9, %v4072_v45, 0.0 }
 0x40f   : > { %v4076_v52 = vpop.eup %3396  ;;  %v1496_v49 = vsub.f32 %v3981_v46, %v1491_v48  ;;  %1508 = vadd.xlane.f32.xlu1 %v1507_v51 }
 0x410   : > { %v1510_v36 = vsel %vm1244_vm9, %v4076_v52, 0.0 }
 0x411   : > { %v1505_v53 = vmul.f32 1.442695, %v1496_v49  ;;  %1511 = vadd.xlane.f32.xlu0 %v1510_v36 }
 0x413   : > { %3402 = vpow2.f32 %v1505_v53 }
 0x415   : > { %v4081_v38 = vpop.eup %3398 }
 0x416   : > { %v1513_v62 = vsel %vm1244_vm9, %v4081_v38, 0.0  ;;  %v1709_v8 = vpop.xlane.xlu0 %1708 }
 0x417   : > { %v4085_v63 = vpop.eup %3400  ;;  %1514 = vadd.xlane.f32.xlu0 %v1513_v62  ;;  %v1722_v10 = vsub.f32 %v3986_v60, %v1709_v8 }
 0x418   : > { %v1712_v1 = vpop.xlane.xlu1 %1711  ;;  %v1516_v46 = vsel %vm1244_vm9, %v4085_v63, 0.0 }
 0x419   : > { %v1723_v2 = vsub.f32 %v3991_v0, %v1712_v1  ;;  %v1727_v12 = vmul.f32 1.442695, %v1722_v10 }
 0x41a   : > { %v4105_v15 = vpop.permute.xlu0 %1765 }
 0x41b   : > { %v1729_v4 = vmul.f32 1.442695, %v1723_v2  ;;  %1517 = vadd.xlane.f32.xlu0 %v1516_v46 }
 0x41c   : > { %v4107_v58 = vpop.permute.xlu1 %1539 }
 0x41d   : > { %v4090_v11 = vpop.eup %3402  ;;  %3404 = vpow2.f32 %v1729_v4 }
 0x41e   : > { %v1519_v5 = vsel %vm1257_vm13, %v4090_v11, 0.0  ;;  %3406 = vpow2.f32 %v1727_v12 }
 0x41f   : > { %1520 = vadd.xlane.f32.xlu0 %v1519_v5 }
 0x420   : > { %1769 = vrot.lane.b32.xlu1 %v3807_v59, %s3544_s9 }
 0x427   : > { %v4096_v6 = vpop.eup %3404 }
 0x428   : > { %v1740_v0 = vsel %vm1244_vm9, %v4096_v6, 0.0  ;;  %v4101_v13 = vpop.eup %3406 }
 0x429   : > { %1741 = vadd.xlane.f32.xlu0 %v1740_v0  ;;  %v1737_v14 = vsel %vm1244_vm9, %v4101_v13, 0.0 }
 0x444   : > { %1738 = vadd.xlane.f32.xlu1 %v1737_v14 }
 0x44b   : > { %v1715_v18 = vpop.xlane.xlu0 %1714 }
 0x44c   : > { %v1724_v61 = vsub.f32 %v4000_v33, %v1715_v18 }
 0x44d   : > { %v1718_v19 = vpop.xlane.xlu1 %1717 }
 0x44e   : > { %v1731_v21 = vmul.f32 1.442695, %v1724_v61  ;;  %v1725_v9 = vsub.f32 %v4003_v35, %v1718_v19 }
 0x44f   : > { %v1721_v60 = vpop.xlane.xlu0 %1720 }
 0x450   : > { %3408 = vpow2.f32 %v1731_v21  ;;  %v1733_v23 = vmul.f32 1.442695, %v1725_v9  ;;  %v1726_v24 = vsub.f32 %v4008_v40, %v1721_v60 }
 0x451   : > { %v1939_v17 = vpop.xlane.xlu1 %1938 }
 0x452   : > { %3410 = vpow2.f32 %v1733_v23  ;;  %v1735_v26 = vmul.f32 1.442695, %v1726_v24  ;;  %v1952_v28 = vsub.f32 %v4013_v44, %v1939_v17 }
 0x453   : > { %v1942_v30 = vpop.xlane.xlu0 %1941 }
 0x454   : > { %3412 = vpow2.f32 %v1735_v26  ;;  %v1957_v31 = vmul.f32 1.442695, %v1952_v28  ;;  %v1953_v34 = vsub.f32 %v4018_v50, %v1942_v30 }
 0x455   : > { %v1945_v33 = vpop.xlane.xlu1 %1944 }
 0x456   : > { %3414 = vpow2.f32 %v1957_v31  ;;  %v1959_v25 = vmul.f32 1.442695, %v1953_v34  ;;  %v1954_v35 = vsub.f32 %v4023_v55, %v1945_v33 }
 0x457   : > { %v1948_v37 = vpop.xlane.xlu0 %1947 }
 0x458   : > { %3416 = vpow2.f32 %v1959_v25  ;;  %v1961_v39 = vmul.f32 1.442695, %v1954_v35  ;;  %v1955_v40 = vsub.f32 %v4028_v56, %v1948_v37 }
 0x459   : > { %v1951_v46 = vpop.xlane.xlu1 %1950 }
 0x45a   : > { %v4116_v41 = vpop.eup %3408  ;;  %3418 = vpow2.f32 %v1961_v39  ;;  %v1963_v27 = vmul.f32 1.442695, %v1955_v40  ;;  %v1956_v4 = vsub.f32 %v4033_v57, %v1951_v46 }
 0x45b   : > { %v1743_v44 = vsel %vm1244_vm9, %v4116_v41, 0.0  ;;  %v4148_v5 = vpop.permute.xlu0 %1767 }
 0x45c   : > { %v4120_v43 = vpop.eup %3410  ;;  %3420 = vpow2.f32 %v1963_v27  ;;  %1744 = vadd.xlane.f32.xlu0 %v1743_v44  ;;  %v1965_v8 = vmul.f32 1.442695, %v1956_v4 }
 0x45d   : > { %v1746_v48 = vsel %vm1244_vm9, %v4120_v43, 0.0 }
 0x45e   : > { %v4122_v50 = vpop.eup %3412 }
 0x45f   : > { %v1749_v55 = vsel %vm1257_vm13, %v4122_v50, 0.0 }
 0x460   : > { %v4128_v56 = vpop.eup %3414  ;;  %1750 = vadd.xlane.f32.xlu1 %v1749_v55  ;;  %1747 = vadd.xlane.f32.xlu0 %v1746_v48 }
 0x461   : > { %v1967_v36 = vsel %vm1244_vm9, %v4128_v56, 0.0 }
 0x462   : > { %v4130_v51 = vpop.eup %3416 }
 0x463   : > { %v1970_v49 = vsel %vm1244_vm9, %v4130_v51, 0.0 }
 0x464   : > { %v4136_v53 = vpop.eup %3418  ;;  %1971 = vadd.xlane.f32.xlu1 %v1970_v49  ;;  %1968 = vadd.xlane.f32.xlu0 %v1967_v36 }
 0x465   : > { %v1973_v2 = vsel %vm1244_vm9, %v4136_v53, 0.0 }
 0x466   : > { %v4138_v62 = vpop.eup %3420 }
 0x467   : > { %v1976_v1 = vsel %vm1244_vm9, %v4138_v62, 0.0 }
 0x468   : > { %1977 = vadd.xlane.f32.xlu0 %v1976_v1  ;;  %1974 = vadd.xlane.f32.xlu1 %v1973_v2 }
 0x479   : > { %1997 = vrot.lane.b32.xlu1 %v3804_v54, %s3545_s29 }
 0x47d   : > { %1999 = vrot.lane.b32.xlu1 %v3807_v59, %s3545_s29 }
 0x47e   : > { %1995 = vrot.lane.b32.xlu0 %v3801_v47, %s3545_s29  ;;  %s4485_s29 = scalar_lea.vmem %s4438_s12, %s3684_s24 }
 0x484   : > { %v1278_v0 = vpop.xlane.xlu1 %1277 }
 0x485   : > { %3422 = vrcp.f32 %v1278_v0 }
 0x48c   : > { %v1281_v10 = vpop.xlane.xlu0 %1280 }
 0x48d   : > { %3424 = vrcp.f32 %v1281_v10 }
 0x48e   : > { %3426 = vpow2.f32 %v1965_v8  ;;  %v1287_v12 = vpop.xlane.xlu1 %1286 }
 0x48f   : > { %v3423_v54 = vpop.eup %3422 }
 0x490   : > { %v1284_v14 = vpop.xlane.xlu0 %1283  ;;  %v1292_v47 = vmul.f32 %v3423_v54, %v4047_v16 }
 0x491   : > { %3428 = vrcp.f32 %v1284_v14 }
 0x492   : > { %3430 = vrcp.f32 %v1287_v12 }
 0x494   : > { %v1290_v18 = vpop.xlane.xlu0 %1289 }
 0x495   : > { %3432 = vrcp.f32 %v1290_v18 }
 0x497   : > { %v3425_v59 = vpop.eup %3424 }
 0x498   : > { %v1294_v61 = vmul.f32 %v3425_v59, %v4052_v20  ;;  %v4152_v57 = vpop.eup %3426 }
 0x499   : > { %v1979_v9 = vsel %vm1257_vm13, %v4152_v57, 0.0 }
 0x49a   : > { %v1301_v19 = vpack.c.bf16 %v1294_v61, %v1292_v47 }
 0x49b   : > { %v3429_v21 = vpop.eup %3428 }
 0x49c   : > { %3118 = vmatmul.mubr.msk.bf16.vlgmr.msra.gmra.mrb[12].mxu0 %vm1244_vm9, %v1301_v19  ;;  %v3431_v60 = vpop.eup %3430  ;;  %v1296_v16 = vmul.f32 %v3429_v21, %v4054_v7  ;;  %v1509_v20 = vpop.xlane.xlu1 %1508 }
 0x49d   : > { %3148 = vmatpush3.bf16.msra.mxu0 %v4041_v3  ;;  %1980 = vadd.xlane.f32.xlu0 %v1979_v9  ;;  %v1298_v24 = vmul.f32 %v3431_v60, %v4058_v22  ;;  %v1553_v3 = vsel %vm1321_vm6, %v4107_v58, 0 }
 0x49e   : > { %v1512_v23 = vpop.xlane.xlu0 %1511  ;;  %3149 = vmatprep.subr.bf16.mxu0 %v3531_v29  ;;  %3121 = vmatprep.mubr.msk.bf16.mxu0 %vm3532_vm3, %v3531_v29 }
 0x49f   : > { %3434 = vrcp.f32 %v1512_v23  ;;  %v1302_v17 = vpack.c.bf16 %v1298_v24, %v1296_v16  ;;  %v3433_v26 = vpop.eup %3432 }
 0x4a0   : > { %3436 = vrcp.f32 %v1509_v20  ;;  %v1300_v7 = vmul.f32 %v3433_v26, %v4066_v32  ;;  %v1770_v39 = vpop.permute.xlu1 %1769 }
 0x4a1   : > { %3150 = vmatpush3.bf16.msra.mxu0 %v3901_v42  ;;  %v1783_v27 = vsel %vm1321_vm6, %v1770_v39, 0 }
 0x4a2   : > { %3151 = vmatprep.subr.bf16.mxu0 %v3531_v29  ;;  %v1303_v22 = vpack.c.bf16 %v1300_v7, %v1300_v7 }
 0x4a4   : > { %v1515_v28 = vpop.xlane.xlu0 %1514  ;;  %3122 = vmatmul.mubr.msk.bf16.gmra.mrb[16].mxu0 %vm1244_vm9, %v1302_v17 }
 0x4a5   : > { %3152 = vmatpush3.bf16.msra.mxu0 %v1553_v3  ;;  %3125 = vmatprep.mubr.msk.bf16.mxu0 %vm3532_vm3, %v3531_v29 }
 0x4a6   : > { %3183 = vmatprep.subr.bf16.mxu0 %v3531_v29 }
 0x4a8   : > { %v1518_v42 = vpop.xlane.xlu0 %1517 }
 0x4a9   : > { %3438 = vrcp.f32 %v1518_v42  ;;  %v3435_v30 = vpop.eup %3434 }
 0x4aa   : > { %3440 = vrcp.f32 %v1515_v28  ;;  %v3437_v31 = vpop.eup %3436  ;;  %v1525_v58 = vmul.f32 %v3435_v30, %v4076_v52 }
 0x4ab   : > { %v1523_v33 = vmul.f32 %v3437_v31, %v4072_v45 }
 0x4ac   : > { %3126 = vmatmul.mubr.msk.bf16.gmra.mrb[20].mxu0 %vm1244_vm9, %v1303_v22  ;;  %v1521_v34 = vpop.xlane.xlu0 %1520 }
 0x4ad   : > { %3153 = vmatprep.mubr.msk.bf16.mxu0 %vm3532_vm3, %v3531_v29  ;;  %3442 = vrcp.f32 %v1521_v34  ;;  %v1532_v32 = vpack.c.bf16 %v1525_v58, %v1523_v33 }
 0x4b3   : > { %v3439_v25 = vpop.eup %3438 }
 0x4b4   : > { %3154 = vmatmul.mubr.msk.bf16.vlgmr.msra.gmra.mrb[24].mxu0 %vm1244_vm9, %v1532_v32  ;;  %v3441_v35 = vpop.eup %3440  ;;  %v1529_v37 = vmul.f32 %v3439_v25, %v4085_v63 }
 0x4b5   : > { %3184 = vmatpush3.bf16.msra.mxu0 %v4105_v15  ;;  %3157 = vmatprep.mubr.msk.bf16.mxu0 %vm3532_vm3, %v3531_v29  ;;  %v1527_v52 = vmul.f32 %v3441_v35, %v4081_v38 }
 0x4b6   : > { %3185 = vmatprep.subr.bf16.mxu0 %v3531_v29  ;;  %v1742_v63 = vpop.xlane.xlu0 %1741 }
 0x4b7   : > { %v1533_v45 = vpack.c.bf16 %v1529_v37, %v1527_v52  ;;  %v3443_v40 = vpop.eup %3442  ;;  %3444 = vrcp.f32 %v1742_v63 }
 0x4b8   : > { %v1531_v15 = vmul.f32 %v3443_v40, %v4090_v11 }
 0x4b9   : > { %3186 = vmatpush3.bf16.msra.mxu0 %v4148_v5 }
 0x4ba   : > { %3187 = vmatprep.subr.bf16.mxu0 %v3531_v29  ;;  %v1534_v38 = vpack.c.bf16 %v1531_v15, %v1531_v15 }
 0x4bc   : > { %3158 = vmatmul.mubr.msk.bf16.gmra.mrb[28].mxu0 %vm1244_vm9, %v1533_v45 }
 0x4bd   : > { %3188 = vmatpush3.bf16.msra.mxu0 %v1783_v27  ;;  %3161 = vmatprep.mubr.msk.bf16.mxu0 %vm3532_vm3, %v3531_v29 }
 0x4be   : > { %3219 = vmatprep.subr.bf16.mxu0 %v3531_v29 }
 0x4c1   : > { %v3445_v55 = vpop.eup %3444 }
 0x4c2   : > { %v1755_v49 = vmul.f32 %v3445_v55, %v4096_v6 }
 0x4c4   : > { %3162 = vmatmul.mubr.msk.bf16.gmra.mrb[32].mxu0 %vm1244_vm9, %v1534_v38 }
 0x4c5   : > { %3189 = vmatprep.mubr.msk.bf16.mxu0 %vm3532_vm3, %v3531_v29 }
 0x4d1   : > { %v1739_v44 = vpop.xlane.xlu1 %1738 }
 0x4d2   : > { %3446 = vrcp.f32 %v1739_v44 }
 0x4dc   : > { %v3447_v48 = vpop.eup %3446 }
 0x4dd   : > { %v1753_v36 = vmul.f32 %v3447_v48, %v4101_v13 }
 0x4df   : > { %v1762_v1 = vpack.c.bf16 %v1755_v49, %v1753_v36 }
 0x4e1   : > { %3190 = vmatmul.mubr.msk.bf16.vlgmr.msra.gmra.mrb[36].mxu0 %vm1244_vm9, %v1762_v1 }
 0x4e2   : > { %3193 = vmatprep.mubr.msk.bf16.mxu0 %vm3532_vm3, %v3531_v29 }
 0x4e9   : > { %v1745_v11 = vpop.xlane.xlu0 %1744 }
 0x4ea   : > { %3448 = vrcp.f32 %v1745_v11 }
 0x4ed   : > { %v1748_v2 = vpop.xlane.xlu0 %1747  ;;  %v1751_v46 = vpop.xlane.xlu1 %1750 }
 0x4ee   : > { %3450 = vrcp.f32 %v1748_v2  ;;  %v3376_v2 = vld [vmem:[%s3699_s3] sm:$0xff]  }
 0x4ef   : > { %3452 = vrcp.f32 %v1751_v46  ;;  %3299 = vmatpush3.bf16.msra.mxu1 %v3376_v2 }
 0x4f0   : > { %3298 = vmatprep.subr.bf16.mxu1 %v3531_v29 }
 0x4f1   : > { %v1969_v4 = vpop.xlane.xlu0 %1968  ;;  %v1972_v5 = vpop.xlane.xlu1 %1971 }
 0x4f2   : > { %3454 = vrcp.f32 %v1969_v4 }
 0x4f3   : > { %3456 = vrcp.f32 %v1972_v5 }
 0x4f4   : > { %v3449_v10 = vpop.eup %3448 }
 0x4f5   : > { %v1978_v0 = vpop.xlane.xlu0 %1977  ;;  %v1975_v8 = vpop.xlane.xlu1 %1974  ;;  %v1757_v14 = vmul.f32 %v3449_v10, %v4116_v41 }
 0x4f6   : > { %3458 = vrcp.f32 %v1978_v0 }
 0x4f7   : > { %3460 = vrcp.f32 %v1975_v8 }
 0x4f8   : > { %v3451_v6 = vpop.eup %3450 }
 0x4f9   : > { %v1996_v13 = vpop.permute.xlu0 %1995  ;;  %v1998_v12 = vpop.permute.xlu1 %1997  ;;  %v1759_v54 = vmul.f32 %v3451_v6, %v4120_v43 }
 0x4fa   : > { %3220 = vmatpush3.bf16.msra.mxu0 %v1996_v13  ;;  %v3453_v59 = vpop.eup %3452  ;;  %v3377_v13 = vld [vmem:[%s3699_s3 + $0x8] sm:$0xff]   ;;  %s4490_s3 = sld [smem:[#allocation17_spill]] (!%p2971_p5) }
 0x4fb   : > { %v1763_v18 = vpack.c.bf16 %v1759_v54, %v1757_v14  ;;  %3221 = vmatprep.subr.bf16.mxu0 %v3531_v29  ;;  %v1761_v61 = vmul.f32 %v3453_v59, %v4122_v50  ;;  %3300 = vmatpush3.bf16.msra.mxu1 %v3377_v13 }
 0x4fc   : > { %v3455_v43 = vpop.eup %3454  ;;  %3269 = vmatprep.subr.bf16.mxu1 %v3531_v29 }
 0x4fd   : > { %3194 = vmatmul.mubr.msk.bf16.gmra.mrb[40].mxu0 %vm1244_vm9, %v1763_v18  ;;  %v2000_v47 = vpop.permute.xlu1 %1999  ;;  %v1764_v19 = vpack.c.bf16 %v1761_v61, %v1761_v61  ;;  %v3457_v21 = vpop.eup %3456  ;;  %v1983_v9 = vmul.f32 %v3455_v43, %v4128_v56 }
 0x4fe   : > { %3222 = vmatpush3.bf16.msra.mxu0 %v1998_v12  ;;  %3197 = vmatprep.mubr.msk.bf16.mxu0 %vm3532_vm3, %v3531_v29  ;;  %v2013_v41 = vsel %vm1321_vm6, %v2000_v47, 0  ;;  %v1985_v60 = vmul.f32 %v3457_v21, %v4130_v51 }
 0x4ff   : > { %3223 = vmatprep.subr.bf16.mxu0 %v3531_v29 }
 0x500   : > { %v3459_v50 = vpop.eup %3458  ;;  %v1992_v23 = vpack.c.bf16 %v1985_v60, %v1983_v9 }
 0x501   : > { %v3461_v16 = vpop.eup %3460  ;;  %v1989_v24 = vmul.f32 %v3459_v50, %v4138_v62 }
 0x502   : > { %3224 = vmatpush3.bf16.msra.mxu0 %v2013_v41  ;;  %v1987_v20 = vmul.f32 %v3461_v16, %v4136_v53 }
 0x503   : > { %3237 = vmatprep.subr.bf16.mxu0 %v3531_v29 }
 0x504   : > { %v1993_v17 = vpack.c.bf16 %v1989_v24, %v1987_v20 }
 0x505   : > { %3198 = vmatmul.mubr.msk.bf16.gmra.mrb[44].mxu0 %vm1244_vm9, %v1764_v19 }
 0x506   : > { %3225 = vmatprep.mubr.msk.bf16.mxu0 %vm3532_vm3, %v3531_v29 }
 0x50d   : > { %3226 = vmatmul.mubr.msk.bf16.vlgmr.msra.gmra.mrb[48].mxu0 %vm1244_vm9, %v1992_v23 }
 0x50e   : > { %3229 = vmatprep.mubr.msk.bf16.mxu0 %vm3532_vm3, %v3531_v29  ;;  %3238 = vmatpush3.bf16.msra.mxu0 %v3376_v2 }
 0x50f   : > { %3239 = vmatprep.subr.bf16.mxu0 %v3531_v29 }
 0x512   : > { %3240 = vmatpush3.bf16.msra.mxu0 %v3377_v13  ;;  %v3484_v13 = vld [vmem:[#allocation2] sm:$0xff] }
 0x513   : > { %3253 = vmatprep.subr.bf16.mxu0 %v3531_v29 }
 0x515   : > { %3230 = vmatmul.mubr.msk.bf16.gmra.mrb[52].mxu0 %vm1244_vm9, %v1993_v17 }
 0x516   : > { %3233 = vmatprep.mubr.msk.bf16.mxu0 %vm3532_vm3, %v3531_v29 }
 0x52a   : > { %v1981_v56 = vpop.xlane.xlu0 %1980 }
 0x52b   : > { %3462 = vrcp.f32 %v1981_v56 }
 0x535   : > { %v3463_v51 = vpop.eup %3462 }
 0x536   : > { %v1991_v26 = vmul.f32 %v3463_v51, %v4152_v57 }
 0x538   : > { %v1994_v3 = vpack.c.bf16 %v1991_v26, %v1991_v26 }
 0x53a   : > { %3234 = vmatmul.mubr.msk.bf16.gmra.mrb[56].mxu0 %vm1244_vm9, %v1994_v3 }
 0x53b   : > { %3241 = vmatprep.mubr.msk.bf16.mxu0 %vm3532_vm3, %v3531_v29 }
 0x56f   : > { %v4227_v53 = vpop.f32.mrb[12].mxu0 }
 0x570   : > { %v3119_v62 = vpop.f32.mrb[13].mxu0 }
 0x571   : > { %v4229_v28 = vpop.f32.mrb[14].mxu0 }
 0x572   : > { %v3120_v7 = vpop.f32.mrb[15].mxu0 }
 0x577   : > { %v4231_v42 = vpop.f32.mrb[16].mxu0 }
 0x578   : > { %v3123_v22 = vpop.f32.mrb[17].mxu0 }
 0x579   : > { %v4233_v30 = vpop.f32.mrb[18].mxu0 }
 0x57a   : > { %v3124_v31 = vpop.f32.mrb[19].mxu0 }
 0x57f   : > { %v4235_v58 = vpop.f32.mrb[20].mxu0 }
 0x580   : > { %v3127_v57 = vpop.f32.mrb[21].mxu0 }
 0x581   : > { %v1378_v34 = vpop.f32.mrb[22].mxu0 }
 0x582   : > { %v3128_v33 = vpop.f32.mrb[23].mxu0 }
 0x587   : > { %v1589_v32 = vpop.f32.mrb[24].mxu0 }
 0x588   : > { %v3155_v25 = vpop.f32.mrb[25].mxu0 }
 0x589   : > { %v1592_v35 = vpop.f32.mrb[26].mxu0 }
 0x58a   : > { %v3344_v37 = vpack.i.bf16 %v1592_v35, %v1589_v32  ;;  %v3156_v52 = vpop.f32.mrb[27].mxu0 }
 0x58c   : > { %3345 = vrot.lane.b32.xlu1 %v3344_v37, %s3546_s4 }
 0x58f   : > { %v1597_v39 = vpop.f32.mrb[28].mxu0 }
 0x590   : > { %v3159_v45 = vpop.f32.mrb[29].mxu0 }
 0x591   : > { %v1600_v40 = vpop.f32.mrb[30].mxu0 }
 0x592   : > { %v3354_v27 = vpack.i.bf16 %v1600_v40, %v1597_v39  ;;  %v3160_v15 = vpop.f32.mrb[31].mxu0 }
 0x594   : > { %3355 = vrot.lane.b32.xlu1 %v3354_v27, %s3546_s4 }
 0x597   : > { %v1605_v38 = vpop.f32.mrb[32].mxu0 }
 0x598   : > { %v3163_v63 = vpop.f32.mrb[33].mxu0 }
 0x599   : > { %v1608_v44 = vpop.f32.mrb[34].mxu0 }
 0x59a   : > { %v3164_v55 = vpop.f32.mrb[35].mxu0 }
 0x5b4   : > { %v1819_v48 = vpop.f32.mrb[36].mxu0 }
 0x5b5   : > { %v3191_v49 = vpop.f32.mrb[37].mxu0 }
 0x5b6   : > { %v1822_v36 = vpop.f32.mrb[38].mxu0 }
 0x5b7   : > { %v3349_v1 = vpack.i.bf16 %v1822_v36, %v1819_v48  ;;  %v3192_v11 = vpop.f32.mrb[39].mxu0 }
 0x5b9   : > { %3350 = vrot.lane.b32.xlu0 %v3349_v1, %s3547_s26 }
 0x5d0   : > { %v1827_v46 = vpop.f32.mrb[40].mxu0 }
 0x5d1   : > { %v3195_v4 = vpop.f32.mrb[41].mxu0 }
 0x5d2   : > { %v1830_v5 = vpop.f32.mrb[42].mxu0  ;;  %v2947_v4 = vld [vmem:[%s4483_s1] ss:$0 sm:$0xff]  ;;  %s4491_s1 = sld [smem:[#allocation19_spill]] (!%p2971_p5) }
 0x5d3   : > { %v3364_v0 = vpack.i.bf16 %v1830_v5, %v1827_v46  ;;  %v3196_v8 = vpop.f32.mrb[43].mxu0 }
 0x5d8   : > { %v1835_v10 = vpop.f32.mrb[44].mxu0 }
 0x5d9   : > { %2104 = vrot.lane.b32.xlu0 %v1835_v10, %s3547_s26  ;;  %v3199_v6 = vpop.f32.mrb[45].mxu0 }
 0x5da   : > { %v1838_v12 = vpop.f32.mrb[46].mxu0 }
 0x5db   : > { %v3200_v14 = vpop.f32.mrb[47].mxu0 }
 0x5e0   : > { %v2049_v54 = vpop.f32.mrb[48].mxu0 }
 0x5e1   : > { %v3227_v18 = vpop.f32.mrb[49].mxu0 }
 0x5e2   : > { %v2052_v59 = vpop.f32.mrb[50].mxu0 }
 0x5e3   : > { %v3359_v47 = vpack.i.bf16 %v2052_v59, %v2049_v54  ;;  %v3228_v61 = vpop.f32.mrb[51].mxu0  ;;  %v3485_v54 = vld [vmem:[#allocation2 + $0x8] sm:$0xff] }
 0x5e5   : > { %3360 = vrot.lane.b32.xlu1 %v3359_v47, %s3548_s21 }
 0x5e8   : > { %v2057_v41 = vpop.f32.mrb[52].mxu0 }
 0x5e9   : > { %3365 = vrot.lane.b32.xlu1 %v3364_v0, %s3547_s26  ;;  %v3231_v43 = vpop.f32.mrb[53].mxu0  ;;  %s4489_s26 = sld [smem:[#allocation16_spill]] (!%p2971_p5) }
 0x5ea   : > { %v2060_v19 = vpop.f32.mrb[54].mxu0 }
 0x5eb   : > { %v3369_v21 = vpack.i.bf16 %v2060_v19, %v2057_v41  ;;  %v3232_v9 = vpop.f32.mrb[55].mxu0 }
 0x5ec   : > { %v3486_v9 = vld [vmem:[#allocation2 + $0x10] sm:$0xff] }
 0x5ed   : > { %3370 = vrot.lane.b32.xlu1 %v3369_v21, %s3548_s21 }
 0x5f1   : > { %2084 = vrot.lane.b32.xlu1 %v1605_v38, %s3546_s4 }
 0x5fe   : > { %v3346_v20 = vpop.permute.xlu1 %3345 }
 0x5ff   : > { %v3348_v56 = vunpack.i.h.bf16 %v3346_v20  ;;  %v3347_v51 = vunpack.i.l.bf16 %v3346_v20 }
 0x601   : > { %v2132_v7 = vsel %vm1159_vm5, %v4229_v28, %v3348_v56  ;;  %v2131_v22 = vsel %vm1159_vm5, %v4227_v53, %v3347_v51 }
 0x606   : > { %v3356_v17 = vpop.permute.xlu1 %3355 }
 0x607   : > { %v3358_v52 = vunpack.i.h.bf16 %v3356_v17  ;;  %v3357_v39 = vunpack.i.l.bf16 %v3356_v17 }
 0x609   : > { %v2134_v28 = vsel %vm1159_vm5, %v4233_v30, %v3358_v52  ;;  %v2133_v27 = vsel %vm1159_vm5, %v4231_v42, %v3357_v39 }
 0x60d   : > { %v2065_v60 = vpop.f32.mrb[56].mxu0 }
 0x60e   : > { %2124 = vrot.lane.b32.xlu1 %v2065_v60, %s3548_s21  ;;  %v3235_v50 = vpop.f32.mrb[57].mxu0  ;;  %s4486_s21 = scalar_lea.vmem %s4440_s14, %s3684_s24 }
 0x60f   : > { %v2068_v23 = vpop.f32.mrb[58].mxu0 }
 0x610   : > { %v3236_v16 = vpop.f32.mrb[59].mxu0  ;;  %v3487_v23 = vld [vmem:[#allocation2 + $0x18] sm:$0xff] }
 0x62b   : > { %v3351_v24 = vpop.permute.xlu0 %3350 }
 0x62c   : > { %v3353_v26 = vunpack.i.h.bf16 %v3351_v24  ;;  %v3352_v3 = vunpack.i.l.bf16 %v3351_v24 }
 0x62e   : > { %v2138_v34 = vsel %vm2136_vm14, %v2132_v7, %v3353_v26  ;;  %v2137_v33 = vsel %vm2136_vm14, %v2131_v22, %v3352_v3  ;;  %v3488_v3 = vld [vmem:[#allocation2 + $0x20] sm:$0x3] }
 0x64b   : > { %v2105_v36 = vpop.permute.xlu0 %2104 }
 0x657   : > { %v3361_v62 = vpop.permute.xlu1 %3360 }
 0x658   : > { %v3363_v31 = vunpack.i.h.bf16 %v3361_v62  ;;  %v3362_v57 = vunpack.i.l.bf16 %v3361_v62 }
 0x65a   : > { %v2144_v32 = vsel %vm2142_vm15, %v2138_v34, %v3363_v31  ;;  %v2143_v25 = vsel %vm2142_vm15, %v2137_v33, %v3362_v57 }
 0x65b   : > { %v2148_v35 = vpack.c.bf16 %v2144_v32, %v2143_v25  ;;  %v3366_v37 = vpop.permute.xlu1 %3365 }
 0x65c   : > { %v3368_v45 = vunpack.i.h.bf16 %v3366_v37  ;;  %v3367_v40 = vunpack.i.l.bf16 %v3366_v37 }
 0x65d   : > { %3242 = vmatmul.mubr.msk.bf16.vlgmr.msra.gmra.mrb[60].mxu0 %vm1034_vm4, %v2148_v35 }
 0x65e   : > { %3257 = vmatprep.mubr.msk.bf16.mxu0 %vm3532_vm3, %v3531_v29  ;;  %v2140_v63 = vsel %vm2136_vm14, %v2134_v28, %v3368_v45  ;;  %v2139_v44 = vsel %vm2136_vm14, %v2133_v27, %v3367_v40 }
 0x65f   : > { %v3371_v53 = vpop.permute.xlu1 %3370 }
 0x660   : > { %v3373_v15 = vunpack.i.h.bf16 %v3371_v53  ;;  %v3372_v38 = vunpack.i.l.bf16 %v3371_v53 }
 0x662   : > { %v2146_v55 = vsel %vm2142_vm15, %v2140_v63, %v3373_v15  ;;  %v2145_v48 = vsel %vm2142_vm15, %v2139_v44, %v3372_v38 }
 0x663   : > { %v2149_v49 = vpack.c.bf16 %v2146_v55, %v2145_v48  ;;  %v2085_v30 = vpop.permute.xlu1 %2084  ;;  %v3378_v48 = vld [vmem:[%s3716_s27] sm:$0xff]  }
 0x664   : > { %v2135_v42 = vsel %vm1159_vm5, %v4235_v58, %v2085_v30  ;;  %3254 = vmatpush3.bf16.msra.mxu0 %v3378_v48 }
 0x665   : > { %3246 = vmatmul.mubr.msk.bf16.vlgmr.msra.gmra.mrb[48].mxu1 %vm1034_vm4, %v2149_v49  ;;  %v2141_v1 = vsel %vm2136_vm14, %v2135_v42, %v2105_v36  ;;  %3255 = vmatprep.subr.bf16.mxu0 %v3531_v29  ;;  %v3379_v42 = vld [vmem:[%s3716_s27 + $0x8] sm:$0xff]  }
 0x666   : > { %3249 = vmatprep.mubr.msk.bf16.mxu1 %vm3532_vm3, %v3531_v29 }
 0x668   : > { %3256 = vmatpush3.bf16.msra.mxu0 %v3379_v42 }
 0x680   : > { %v2125_v11 = vpop.permute.xlu1 %2124 }
 0x681   : > { %v2147_v2 = vsel %vm2142_vm15, %v2141_v1, %v2125_v11  ;;  %v3380_v11 = vld [vmem:[%s3726_s23] sm:$0xff]  }
 0x682   : > { %v2150_v46 = vpack.c.bf16 %v2147_v2, %v2147_v2  ;;  %3270 = vmatpush3.bf16.msra.mxu1 %v3380_v11  ;;  %v3381_v2 = vld [vmem:[%s3726_s23 + $0x8] sm:$0xff]  }
 0x683   : > { %3271 = vmatprep.subr.bf16.mxu1 %v3531_v29 }
 0x684   : > { %3250 = vmatmul.mubr.msk.bf16.gmra.mrb[52].mxu1 %vm1034_vm4, %v2150_v46 }
 0x685   : > { %3277 = vmatprep.mubr.msk.bf16.mxu1 %vm3532_vm3, %v3531_v29 }
 0x686   : > { %3272 = vmatpush3.bf16.msra.mxu1 %v3381_v2 }
 0x687   : > { %3273 = vmatprep.subr.bf16.mxu1 %v3531_v29 }
 0x730   : > { %v2217_v5 = vpop.f32.mrb[60].mxu0 }
 0x731   : > { %v2218_v0 = vadd.f32 %v2947_v4, %v2217_v5  ;;  %v3243_v58 = vpop.f32.mrb[61].mxu0 }
 0x732   : > { %v2220_v8 = vpop.f32.mrb[62].mxu0 }
 0x733   : > { %v2221_v10 = vadd.f32 %v2947_v4, %v2220_v8  ;;  %v3244_v6 = vpop.f32.mrb[63].mxu0  ;;  %v2239_v12 = vadd.f32 %v3484_v13, %v2218_v0 }
 0x735   : > { %v2246_v14 = vsel %vm1034_vm4, %v2239_v12, 0.0  ;;  %v2240_v18 = vadd.f32 %v3485_v54, %v2221_v10 }
 0x736   : > { %2247 = vadd.xlane.f32.xlu0 %v2246_v14 }
 0x737   : > { %v2249_v59 = vsel %vm1034_vm4, %v2240_v18, 0.0 }
 0x738   : > { %v2225_v47 = vpop.f32.mrb[48].mxu1  ;;  %2250 = vadd.xlane.f32.xlu1 %v2249_v59 }
 0x739   : > { %v2226_v61 = vadd.f32 %v2947_v4, %v2225_v47  ;;  %v3247_v41 = vpop.f32.mrb[49].mxu1 }
 0x73a   : > { %v2228_v43 = vpop.f32.mrb[50].mxu1 }
 0x73b   : > { %v2229_v19 = vadd.f32 %v2947_v4, %v2228_v43  ;;  %v3248_v21 = vpop.f32.mrb[51].mxu1  ;;  %v2241_v60 = vadd.f32 %v3486_v9, %v2226_v61 }
 0x73d   : > { %v2252_v50 = vsel %vm1034_vm4, %v2241_v60, 0.0  ;;  %v2242_v16 = vadd.f32 %v3487_v23, %v2229_v19  ;;  %v2954_v19 = vld [vmem:[%s4485_s29] ss:$0 sm:$0xff] }
 0x73e   : > { %2253 = vadd.xlane.f32.xlu0 %v2252_v50 }
 0x73f   : > { %v2255_v20 = vsel %vm1034_vm4, %v2242_v16, 0.0 }
 0x742   : > { %2256 = vadd.xlane.f32.xlu0 %v2255_v20 }
 0x757   : > { %v2233_v24 = vpop.f32.mrb[52].mxu1 }
 0x758   : > { %v2234_v17 = vadd.f32 %v2947_v4, %v2233_v24  ;;  %v3251_v56 = vpop.f32.mrb[53].mxu1 }
 0x759   : > { %v2236_v51 = vpop.f32.mrb[54].mxu1 }
 0x75a   : > { %v3252_v26 = vpop.f32.mrb[55].mxu1  ;;  %v2243_v62 = vadd.f32 %v3488_v3, %v2234_v17 }
 0x75c   : > { %v2259_v7 = vsel %vm2258_vm0, %v2243_v62, 0.0 }
 0x75d   : > { %2260 = vadd.xlane.f32.xlu1 %v2259_v7 }
 0x7c3   : > { %v2248_v22 = vpop.xlane.xlu0 %2247 }
 0x7c4   : > { %v2263_v31 = vmul.f32 0.03125, %v2248_v22 }
 0x7c5   : > { %v2251_v57 = vpop.xlane.xlu1 %2250 }
 0x7c6   : > { %v2268_v34 = vsub.f32 %v2239_v12, %v2263_v31  ;;  %v2264_v33 = vmul.f32 0.03125, %v2251_v57 }
 0x7c8   : > { %v2269_v32 = vsub.f32 %v2240_v18, %v2264_v33  ;;  %v2273_v25 = vmul.f32 %v2268_v34, %v2268_v34  ;;  %v2953_v18 = vld [vmem:[%s4484_s6] ss:$0 sm:$0xff]  ;;  %s4488_s6 = sld [smem:[#allocation18_spill]] (!%p2971_p5) }
 0x7ca   : > { %v2278_v35 = vsel %vm1034_vm4, %v2273_v25, 0.0  ;;  %v2274_v37 = vmul.f32 %v2269_v32, %v2269_v32  ;;  %v3382_v25 = vld [vmem:[%s3726_s23 + $0x10] sm:$0xff]  }
 0x7cb   : > { %2279 = vadd.xlane.f32.xlu0 %v2278_v35  ;;  %v2254_v52 = vpop.xlane.xlu0 %2253  ;;  %3274 = vmatpush3.bf16.msra.mxu1 %v3382_v25  ;;  %v3383_v35 = vld [vmem:[%s3726_s23 + $0x18] sm:$0xff]  }
 0x7cc   : > { %v2265_v39 = vmul.f32 0.03125, %v2254_v52  ;;  %v2281_v45 = vsel %vm1034_vm4, %v2274_v37, 0.0  ;;  %3275 = vmatprep.subr.bf16.mxu1 %v3531_v29  ;;  %v2955_v37 = vld [vmem:[%s4486_s21] ss:$0 sm:$0xff] }
 0x7cd   : > { %2282 = vadd.xlane.f32.xlu1 %v2281_v45 }
 0x7ce   : > { %v2270_v40 = vsub.f32 %v2241_v60, %v2265_v39 }
 0x7cf   : > { %v2257_v53 = vpop.xlane.xlu0 %2256  ;;  %3276 = vmatpush3.bf16.msra.mxu1 %v3383_v35 }
 0x7d0   : > { %v2266_v28 = vmul.f32 0.03125, %v2257_v53  ;;  %v2275_v27 = vmul.f32 %v2270_v40, %v2270_v40 }
 0x7d2   : > { %v2271_v15 = vsub.f32 %v2242_v16, %v2266_v28  ;;  %v2284_v38 = vsel %vm1034_vm4, %v2275_v27, 0.0 }
 0x7d3   : > { %2285 = vadd.xlane.f32.xlu0 %v2284_v38 }
 0x7d4   : > { %v2276_v63 = vmul.f32 %v2271_v15, %v2271_v15 }
 0x7d6   : > { %v2287_v44 = vsel %vm1034_vm4, %v2276_v63, 0.0 }
 0x7d7   : > { %2288 = vadd.xlane.f32.xlu1 %v2287_v44 }
 0x7ea   : > { %v2261_v55 = vpop.xlane.xlu1 %2260 }
 0x7eb   : > { %v2267_v49 = vmul.f32 0.03125, %v2261_v55 }
 0x7ed   : > { %v2272_v30 = vsub.f32 %v2243_v62, %v2267_v49 }
 0x7ef   : > { %v2277_v36 = vmul.f32 %v2272_v30, %v2272_v30 }
 0x7f1   : > { %v2290_v1 = vsel %vm2258_vm0, %v2277_v36, 0.0 }
 0x7f2   : > { %2291 = vadd.xlane.f32.xlu0 %v2290_v1 }
 0x858   : > { %v2280_v46 = vpop.xlane.xlu0 %2279 }
 0x859   : > { %v2293_v4 = vmul.f32 0.03125, %v2280_v46 }
 0x85a   : > { %v2283_v5 = vpop.xlane.xlu1 %2282 }
 0x85b   : > { %v2298_v0 = vadd.f32 1e-05, %v2293_v4  ;;  %v2294_v58 = vmul.f32 0.03125, %v2283_v5 }
 0x85d   : > { %3464 = vrsqrt.f32 %v2298_v0  ;;  %v2299_v8 = vadd.f32 1e-05, %v2294_v58 }
 0x85f   : > { %3466 = vrsqrt.f32 %v2299_v8  ;;  %v2961_v8 = vld [vmem:[%s862_s5] ss:$0 sm:$0xff] }
 0x860   : > { %v2286_v10 = vpop.xlane.xlu0 %2285 }
 0x861   : > { %v2295_v6 = vmul.f32 0.03125, %v2286_v10 }
 0x863   : > { %v2300_v13 = vadd.f32 1e-05, %v2295_v6 }
 0x864   : > { %v2289_v12 = vpop.xlane.xlu1 %2288 }
 0x865   : > { %3468 = vrsqrt.f32 %v2300_v13  ;;  %v2296_v14 = vmul.f32 0.03125, %v2289_v12 }
 0x867   : > { %v3465_v54 = vpop.eup %3464  ;;  %v2301_v59 = vadd.f32 1e-05, %v2296_v14 }
 0x868   : > { %v2308_v47 = vmul.f32 %v3465_v54, %v2268_v34 }
 0x869   : > { %v3467_v61 = vpop.eup %3466  ;;  %3470 = vrsqrt.f32 %v2301_v59 }
 0x86a   : > { %v2319_v41 = vmul.f32 %v2953_v18, %v2308_v47  ;;  %v2309_v43 = vmul.f32 %v3467_v61, %v2269_v32 }
 0x86c   : > { %v2320_v21 = vmul.f32 %v2953_v18, %v2309_v43  ;;  %v4307_v9 = vadd.f32 %v2954_v19, %v2319_v41 }
 0x86e   : > { %v4309_v60 = vadd.f32 %v2954_v19, %v2320_v21 }
 0x86f   : > { %v3469_v50 = vpop.eup %3468 }
 0x870   : > { %v2310_v23 = vmul.f32 %v3469_v50, %v2270_v40  ;;  %v2335_v16 = vpack.c.bf16 %v4309_v60, %v4307_v9 }
 0x872   : > { %3258 = vmatmul.mubr.msk.bf16.vlgmr.msra.gmra.mrb[64].mxu0 %vm1034_vm4, %v2335_v16  ;;  %v2321_v17 = vmul.f32 %v2953_v18, %v2310_v23 }
 0x873   : > { %v3471_v20 = vpop.eup %3470  ;;  %3261 = vmatprep.mubr.msk.bf16.mxu0 %vm3532_vm3, %v3531_v29 }
 0x874   : > { %v2311_v24 = vmul.f32 %v3471_v20, %v2271_v15  ;;  %v4316_v51 = vadd.f32 %v2954_v19, %v2321_v17 }
 0x876   : > { %v2322_v56 = vmul.f32 %v2953_v18, %v2311_v24 }
 0x878   : > { %v4318_v26 = vadd.f32 %v2954_v19, %v2322_v56 }
 0x87a   : > { %v2336_v3 = vpack.c.bf16 %v4318_v26, %v4316_v51 }
 0x87c   : > { %3262 = vmatmul.mubr.msk.bf16.gmra.mrb[68].mxu0 %vm1034_vm4, %v2336_v3 }
 0x87d   : > { %3265 = vmatprep.mubr.msk.bf16.mxu0 %vm3532_vm3, %v3531_v29 }
 0x87f   : > { %v2292_v62 = vpop.xlane.xlu0 %2291 }
 0x880   : > { %v2297_v7 = vmul.f32 0.03125, %v2292_v62 }
 0x882   : > { %v2302_v22 = vadd.f32 1e-05, %v2297_v7 }
 0x884   : > { %3472 = vrsqrt.f32 %v2302_v22 }
 0x88e   : > { %v3473_v31 = vpop.eup %3472 }
 0x88f   : > { %v2312_v57 = vmul.f32 %v3473_v31, %v2272_v30 }
 0x891   : > { %v2323_v34 = vmul.f32 %v2953_v18, %v2312_v57 }
 0x893   : > { %v4325_v33 = vadd.f32 %v2954_v19, %v2323_v34 }
 0x895   : > { %v2337_v32 = vpack.c.bf16 %v4325_v33, %v4325_v33 }
 0x897   : > { %3266 = vmatmul.mubr.msk.bf16.gmra.mrb[72].mxu0 %vm1034_vm4, %v2337_v32 }
 0x945   : > { %v2404_v52 = vpop.f32.mrb[64].mxu0 }
 0x946   : > { %v2405_v39 = vadd.f32 %v2955_v37, %v2404_v52  ;;  %v3259_v45 = vpop.f32.mrb[65].mxu0 }
 0x947   : > { %v2407_v40 = vpop.f32.mrb[66].mxu0 }
 0x948   : > { %v2408_v53 = vadd.f32 %v2955_v37, %v2407_v40  ;;  %v3260_v28 = vpop.f32.mrb[67].mxu0  ;;  %v2426_v27 = vmax.f32 %v2405_v39, 0.0 }
 0x94a   : > { %v2427_v15 = vmax.f32 %v2408_v53, 0.0 }
 0x94c   : > { %v2431_v38 = vpack.c.bf16 %v2427_v15, %v2426_v27 }
 0x94e   : > { %3278 = vmatmul.mubr.msk.bf16.vlgmr.msra.gmra.mrb[56].mxu1 %vm2473_vm1, %v2431_v38 }
 0x94f   : > { %v2412_v63 = vpop.f32.mrb[68].mxu0  ;;  %3281 = vmatprep.mubr.msk.bf16.mxu1 %vm3532_vm3, %v3531_v29 }
 0x950   : > { %v2413_v44 = vadd.f32 %v2955_v37, %v2412_v63  ;;  %v3263_v55 = vpop.f32.mrb[69].mxu0 }
 0x951   : > { %v2415_v48 = vpop.f32.mrb[70].mxu0 }
 0x952   : > { %v2416_v49 = vadd.f32 %v2955_v37, %v2415_v48  ;;  %v3264_v30 = vpop.f32.mrb[71].mxu0  ;;  %v2428_v42 = vmax.f32 %v2413_v44, 0.0 }
 0x954   : > { %v2429_v36 = vmax.f32 %v2416_v49, 0.0 }
 0x956   : > { %v2432_v1 = vpack.c.bf16 %v2429_v36, %v2428_v42 }
 0x958   : > { %3282 = vmatmul.mubr.msk.bf16.gmra.mrb[60].mxu1 %vm2473_vm1, %v2432_v1 }
 0x959   : > { %3285 = vmatprep.mubr.msk.bf16.mxu1 %vm3532_vm3, %v3531_v29 }
 0x96a   : > { %v2420_v11 = vpop.f32.mrb[72].mxu0 }
 0x96b   : > { %v2421_v2 = vadd.f32 %v2955_v37, %v2420_v11  ;;  %v3267_v46 = vpop.f32.mrb[73].mxu0 }
 0x96c   : > { %v2423_v4 = vpop.f32.mrb[74].mxu0 }
 0x96d   : > { %v2430_v5 = vmax.f32 %v2421_v2, 0.0  ;;  %v3268_v0 = vpop.f32.mrb[75].mxu0 }
 0x96f   : > { %v2433_v58 = vpack.c.bf16 %v2430_v5, %v2430_v5 }
 0x971   : > { %3286 = vmatmul.mubr.msk.bf16.gmra.mrb[64].mxu1 %vm2473_vm1, %v2433_v58 }
 0xa21   : > { %v2517_v10 = vpop.f32.mrb[56].mxu1 }
 0xa22   : > { %v2518_v6 = vadd.f32 %v2961_v8, %v2517_v10  ;;  %v3279_v13 = vpop.f32.mrb[57].mxu1  ;;  %v2969_v10 = vld [vmem:[%s865_s2] ss:$0 sm:$0xff] }
 0xa23   : > { %v2520_v12 = vpop.f32.mrb[58].mxu1 }
 0xa24   : > { %v2521_v14 = vadd.f32 %v2961_v8, %v2520_v12  ;;  %v3280_v29 = vpop.f32.mrb[59].mxu1  ;;  %v2539_v54 = vadd.f32 %v2518_v6, %v4307_v9 }
 0xa26   : > { %v2540_v18 = vadd.f32 %v2521_v14, %v4309_v60  ;;  %v2546_v59 = vsel %vm1034_vm4, %v2539_v54, 0.0  ;;  %v2970_v14 = vld [vmem:[%s4487_s20] ss:$0 sm:$0xff] }
 0xa27   : > { %2547 = vadd.xlane.f32.xlu1 %v2546_v59 }
 0xa28   : > { %v2549_v47 = vsel %vm1034_vm4, %v2540_v18, 0.0 }
 0xa29   : > { %2550 = vadd.xlane.f32.xlu0 %v2549_v47 }
 0xa2b   : > { %v2525_v61 = vpop.f32.mrb[60].mxu1 }
 0xa2c   : > { %v2526_v41 = vadd.f32 %v2961_v8, %v2525_v61  ;;  %v3283_v43 = vpop.f32.mrb[61].mxu1 }
 0xa2d   : > { %v2528_v19 = vpop.f32.mrb[62].mxu1 }
 0xa2e   : > { %v2541_v21 = vadd.f32 %v2526_v41, %v4316_v51  ;;  %v2529_v50 = vadd.f32 %v2961_v8, %v2528_v19  ;;  %v3284_v23 = vpop.f32.mrb[63].mxu1 }
 0xa30   : > { %v2542_v16 = vadd.f32 %v2529_v50, %v4318_v26  ;;  %v2552_v9 = vsel %vm1034_vm4, %v2541_v21, 0.0 }
 0xa31   : > { %2553 = vadd.xlane.f32.xlu1 %v2552_v9 }
 0xa32   : > { %v2555_v60 = vsel %vm1034_vm4, %v2542_v16, 0.0 }
 0xa33   : > { %2556 = vadd.xlane.f32.xlu0 %v2555_v60 }
 0xa44   : > { %v2533_v20 = vpop.f32.mrb[64].mxu1 }
 0xa45   : > { %v2534_v24 = vadd.f32 %v2961_v8, %v2533_v20  ;;  %v3287_v17 = vpop.f32.mrb[65].mxu1 }
 0xa46   : > { %v2536_v56 = vpop.f32.mrb[66].mxu1 }
 0xa47   : > { %v2543_v3 = vadd.f32 %v2534_v24, %v4325_v33  ;;  %v3288_v62 = vpop.f32.mrb[67].mxu1 }
 0xa49   : > { %v2558_v7 = vsel %vm2258_vm0, %v2543_v3, 0.0 }
 0xa4a   : > { %2559 = vadd.xlane.f32.xlu1 %v2558_v7 }
 0xab4   : > { %v2548_v51 = vpop.xlane.xlu1 %2547 }
 0xab5   : > { %v2561_v22 = vmul.f32 0.03125, %v2548_v51 }
 0xab6   : > { %v2551_v31 = vpop.xlane.xlu0 %2550 }
 0xab7   : > { %v2566_v26 = vsub.f32 %v2539_v54, %v2561_v22  ;;  %v2562_v57 = vmul.f32 0.03125, %v2551_v31 }
 0xab9   : > { %v2567_v34 = vsub.f32 %v2540_v18, %v2562_v57  ;;  %v2571_v32 = vmul.f32 %v2566_v26, %v2566_v26  ;;  %v3489_v57 = vld [vmem:[%s4488_s6] sm:$0xff] (!%p2971_p5)  }
 0xabb   : > { %v2576_v25 = vsel %vm1034_vm4, %v2571_v32, 0.0  ;;  %v2572_v35 = vmul.f32 %v2567_v34, %v2567_v34  ;;  %v3490_v32 = vld [vmem:[%s4488_s6 + $0x8] sm:$0xff] (!%p2971_p5)  }
 0xabc   : > { %2577 = vadd.xlane.f32.xlu0 %v2576_v25 }
 0xabd   : > { %v2579_v37 = vsel %vm1034_vm4, %v2572_v35, 0.0 }
 0xabe   : > { %v2554_v52 = vpop.xlane.xlu1 %2553  ;;  %2580 = vadd.xlane.f32.xlu1 %v2579_v37 }
 0xabf   : > { %v2563_v33 = vmul.f32 0.03125, %v2554_v52 }
 0xac0   : > { %v2557_v39 = vpop.xlane.xlu0 %2556 }
 0xac1   : > { %v2568_v45 = vsub.f32 %v2541_v21, %v2563_v33  ;;  %v2564_v40 = vmul.f32 0.03125, %v2557_v39  ;;  %v2972_v33 = vld [vmem:[%s4489_s26] ss:$0 sm:$0xff] (!%p2971_p5) }
 0xac3   : > { %v2569_v53 = vsub.f32 %v2542_v16, %v2564_v40  ;;  %v2573_v28 = vmul.f32 %v2568_v45, %v2568_v45 }
 0xac5   : > { %v2582_v27 = vsel %vm1034_vm4, %v2573_v28, 0.0  ;;  %v2574_v15 = vmul.f32 %v2569_v53, %v2569_v53 }
 0xac6   : > { %2583 = vadd.xlane.f32.xlu0 %v2582_v27  ;;  %v2974_v27 = vld [vmem:[%s4491_s1] ss:$0 sm:$0xff] (!%p2971_p5) }
 0xac7   : > { %v2585_v38 = vsel %vm1034_vm4, %v2574_v15, 0.0 }
 0xac8   : > { %2586 = vadd.xlane.f32.xlu1 %v2585_v38 }
 0xad7   : > { %v2560_v63 = vpop.xlane.xlu1 %2559 }
 0xad8   : > { %v2565_v44 = vmul.f32 0.03125, %v2560_v63 }
 0xada   : > { %v2570_v55 = vsub.f32 %v2543_v3, %v2565_v44 }
 0xadc   : > { %v2575_v48 = vmul.f32 %v2570_v55, %v2570_v55 }
 0xade   : > { %v2588_v49 = vsel %vm2258_vm0, %v2575_v48, 0.0 }
 0xadf   : > { %2589 = vadd.xlane.f32.xlu0 %v2588_v49 }
 0xb49   : > { %v2578_v30 = vpop.xlane.xlu0 %2577 }
 0xb4a   : > { %v2591_v42 = vmul.f32 0.03125, %v2578_v30 }
 0xb4b   : > { %v2581_v36 = vpop.xlane.xlu1 %2580 }
 0xb4c   : > { %v2596_v1 = vadd.f32 1e-05, %v2591_v42  ;;  %v2592_v11 = vmul.f32 0.03125, %v2581_v36 }
 0xb4e   : > { %3474 = vrsqrt.f32 %v2596_v1  ;;  %v2597_v2 = vadd.f32 1e-05, %v2592_v11 }
 0xb50   : > { %3476 = vrsqrt.f32 %v2597_v2 }
 0xb53   : > { %v2584_v46 = vpop.xlane.xlu0 %2583 }
 0xb54   : > { %v2593_v4 = vmul.f32 0.03125, %v2584_v46 }
 0xb55   : > { %v2587_v5 = vpop.xlane.xlu1 %2586 }
 0xb56   : > { %v2598_v0 = vadd.f32 1e-05, %v2593_v4  ;;  %v2594_v58 = vmul.f32 0.03125, %v2587_v5 }
 0xb58   : > { %v3475_v8 = vpop.eup %3474  ;;  %3478 = vrsqrt.f32 %v2598_v0  ;;  %v2599_v6 = vadd.f32 1e-05, %v2594_v58 }
 0xb59   : > { %v2606_v13 = vmul.f32 %v3475_v8, %v2566_v26 }
 0xb5a   : > { %v3477_v12 = vpop.eup %3476  ;;  %3480 = vrsqrt.f32 %v2599_v6 }
 0xb5b   : > { %v2617_v29 = vmul.f32 %v2969_v10, %v2606_v13  ;;  %v2607_v54 = vmul.f32 %v3477_v12, %v2567_v34  ;;  %v3549_v34 = vmov (!%p2971_p5), 0.0  }
 0xb5c   : > { %3289 = vmatprep.subr.bf16.mxu0 (!%p2971_p5), %v3549_v34  ;;  %3293 = vmatprep.mubr.msk.bf16.mxu0 (!%p2971_p5), %vm3550_vm2, %v3549_v34 }
 0xb5d   : > { %v2628_v18 = vadd.f32 %v2970_v14, %v2617_v29  ;;  %v2618_v59 = vmul.f32 %v2969_v10, %v2607_v54  ;;  %3290 = vmatpush3.bf16.msra.mxu0 (!%p2971_p5), %v3489_v57 }
 0xb5e   : > { %3291 = vmatprep.subr.bf16.mxu0 (!%p2971_p5), %v3549_v34 }
 0xb5f   : > { %2633 = vst.msk [vmem:[#allocation2] sm:$0xff] %vm1034_vm4, %v2628_v18  ;;  %v2629_v47 = vadd.f32 %v2970_v14, %v2618_v59  ;;  %v2644_v62 = vsel (!%p2971_p5), %vm2258_vm0, %v2628_v18, 0.0 }
 0xb60   : > { %2645 = vadd.xlane.f32.xlu0 (!%p2971_p5), %v2644_v62 }
 0xb61   : > { %2634 = vst.msk [vmem:[#allocation2 + $0x8] sm:$0xff] %vm1034_vm4, %v2629_v47  ;;  %3292 = vmatpush3.bf16.msra.mxu0 (!%p2971_p5), %v3490_v32 }
 0xb62   : > { %v3479_v61 = vpop.eup %3478 }
 0xb63   : > { %v2608_v41 = vmul.f32 %v3479_v61, %v2568_v45  ;;  %v2973_v45 = vld [vmem:[%s4490_s3] ss:$0 sm:$0xff] (!%p2971_p5) }
 0xb64   : > { %v3481_v43 = vpop.eup %3480 }
 0xb65   : > { %v2619_v19 = vmul.f32 %v2969_v10, %v2608_v41  ;;  %v2609_v21 = vmul.f32 %v3481_v43, %v2569_v53 }
 0xb67   : > { %v2630_v50 = vadd.f32 %v2970_v14, %v2619_v19  ;;  %v2620_v23 = vmul.f32 %v2969_v10, %v2609_v21 }
 0xb69   : > { %2635 = vst.msk [vmem:[#allocation2 + $0x10] sm:$0xff] %vm1034_vm4, %v2630_v50  ;;  %v2631_v16 = vadd.f32 %v2970_v14, %v2620_v23 }
 0xb6b   : > { %2636 = vst.msk [vmem:[#allocation2 + $0x18] sm:$0xff] %vm1034_vm4, %v2631_v16 }
 0xb6c   : > { %v2590_v9 = vpop.xlane.xlu0 %2589 }
 0xb6d   : > { %v2595_v60 = vmul.f32 0.03125, %v2590_v9 }
 0xb6f   : > { %v2600_v20 = vadd.f32 1e-05, %v2595_v60 }
 0xb71   : > { %3482 = vrsqrt.f32 %v2600_v20 }
 0xb7b   : > { %v3483_v24 = vpop.eup %3482 }
 0xb7c   : > { %v2610_v17 = vmul.f32 %v3483_v24, %v2570_v55  ;;  %2641 = sbr.rel (%p2971_p5) target bundleno = 3443 (0xd73), region = 120 }
 0xb7e   : > { %v2621_v56 = vmul.f32 %v2969_v10, %v2610_v17 }
 0xb80   : > { %v2632_v3 = vadd.f32 %v2970_v14, %v2621_v56 }
 0xb82   : > { %2637 = vst.msk [vmem:[#allocation2 + $0x20] sm:$0x3] %vm2258_vm0, %v2632_v3 }
 0xbed   : > { %v2646_v7 = vpop.xlane.xlu0 %2645 }
 0xbee   : > { %v2647_v51 = vmul.f32 0.03125, %v2646_v7 }
 0xbf0   : > { %v2648_v22 = vsub.f32 %v2628_v18, %v2647_v51 }
 0xbf2   : > { %v2649_v31 = vmul.f32 %v2648_v22, %v2648_v22 }
 0xbf4   : > { %v2650_v26 = vsel %vm2258_vm0, %v2649_v31, 0.0 }
 0xbf5   : > { %2651 = vadd.xlane.f32.xlu0 %v2650_v26 }
 0xc82   : > { %v2652_v25 = vpop.xlane.xlu0 %2651 }
 0xc83   : > { %v2653_v35 = vmul.f32 0.03125, %v2652_v25 }
 0xc85   : > { %v2654_v37 = vadd.f32 1e-05, %v2653_v35 }
 0xc87   : > { %3491 = vrsqrt.f32 %v2654_v37 }
 0xc91   : > { %v3492_v52 = vpop.eup %3491 }
 0xc92   : > { %v2656_v39 = vmul.f32 %v3492_v52, %v2648_v22 }
 0xc94   : > { %v2663_v40 = vmul.f32 %v2972_v33, %v2656_v39 }
 0xc96   : > { %v2670_v53 = vadd.f32 %v2973_v45, %v2663_v40 }
 0xc98   : > { %v2671_v28 = vpack.c.bf16 %v2670_v53, %v2670_v53 }
 0xc9a   : > { %3294 = vmatmul.mubr.msk.bf16.vlgmr.msra.gmra.mrb[0].mxu0 %vm1034_vm4, %v2671_v28 }
 0xd6d   : > { %v2732_v15 = vpop.f32.mrb[0].mxu0 }
 0xd6e   : > { %v2733_v38 = vadd.f32 %v2974_v27, %v2732_v15  ;;  %v3295_v63 = vpop.f32.mrb[1].mxu0 }
 0xd6f   : > { %v2735_v44 = vpop.f32.mrb[2].mxu0 }
 0xd70   : > { %v2738_v55 = vmax.f32 %v2733_v38, 0.0  ;;  %v3296_v48 = vpop.f32.mrb[3].mxu0 }
 0xd72   : > { %2739 = vst.msk [vmem:[#allocation3] sm:$0x3] %vm2258_vm0, %v2738_v55 }
 0xd73 PF: > { %p3305_p6 = scmp.eq.s32.totalorder %s3678_s30, 1  ;;  %s3551_s27 = smov [#allocation3]  }
 0xd74   : > { %s2747_s20 = sshll.u32 %s3551_s27, 4  ;;  %s2748_s20 = int_to_ptr.vmem [resolvable:$true] %s2747_s20 }
 0xd75   : > { %s3493_s24 = scalar_lea.vmem %s2748_s20, 32  ;;  %p3500_p10 = scmp.lt.s32.totalorder %s2748_s20, %s2748_s20 }
 0xd76   : > { %p3494_p7 = scmp.ne.s32.totalorder %s2748_s20, %s3493_s24  ;;  %p3501_p11 = scmp.lt.s32.totalorder %s3493_s24, %s3493_s24 }
 0xd78   : > { %p3495_p8 = pnand %p3494_p7, %p3305_p6  ;;  %p3502_p12 = por %p3501_p11, %p3500_p10 }
 0xd7a   : > { %p3496_p9 = pneg %p3495_p8 }
 0xd7c   : > { %p3503_p13 = pnand %p3502_p12, %p3496_p9 }
 0xd7e   : > { %3506 = shalt.err (!%p3503_p13)
}
 0xd7f   : > { %s4492_s9 = sld [smem:[#allocation20_spill]] }
 0xd85   : > { %s3507_s29 = scalar_lea.hbm %s4492_s9, 32 }
 0xd86   : > { %p3508_p0 = scmp.ne.s32.totalorder %s4492_s9, %s3507_s29  ;;  %p3513_p3 = scmp.lt.u32.totalorder %s3507_s29, %s4492_s9 }
 0xd88   : > { %p3509_p1 = pnand %p3508_p0, %p3305_p6 }
 0xd8a   : > { %p3510_p2 = pneg %p3509_p1 }
 0xd8c   : > { %p3515_p4 = pnand %p3513_p3, %p3510_p2 }
 0xd8e   : > { %3518 = shalt.err (!%p3515_p4)
}
 0xd8f   : > { %3302 = dma.vmem_to_hbm [thread:$0]  (%p3305_p6), %s2748_s20, 32, %s4492_s9, [#allocation4]  }
 0xd90   : > { %3524 = dma.done.wait (%p3305_p6), [#allocation4], 32  }
 0xd91   : > { %3526 = vsyncadd (%p3305_p6), [#allocation4], 4294967264 }
 0xd92 PF: > { %s4493_s7 = sld [smem:[#allocation6_spill]] }
 0xd98   : > { %s34_s4 = sadd.s32 1, %s4493_s7  }
 0xd99   : > { %p31_p5 = scmp.ge.s32.totalorder %s34_s4, 4  }
 0xd9b   :  { %33 = sbr.rel (!%p31_p5) target bundleno = 16 (0x10), region = 180 }
 0xda2   :  { %2760 = vsyncpa [#allocation4], 1 }
 0xda3   :  { %2762 = vsyncpa [#allocation4 + $0x1], 1 }

</bundles_post_ra>
